<compile_context>
chip_gen: v7x
topology: tpu7x:2x2x1
jax: 0.10.0
libtpu: 0.0.40
codegen_flags: <defaults>
</compile_context>

<pallas_src>
import functools

import jax
import jax.numpy as jnp
from jax.experimental import pallas as pl
from jax.experimental.pallas import tpu as pltpu

LN_EPS = 1e-5   # PyTorch nn.LayerNorm default
_LANE = 128


def _round_up(n, m):
    return (n + m - 1) // m * m


# ---------------------------------------------------------------------------
# Kernel
# ---------------------------------------------------------------------------
def _masked_layernorm(h, gamma, beta, valid, n_true):
    """LayerNorm over the first n_true lanes of h (padded lanes of h are 0)."""
    inv_n = 1.0 / float(n_true)
    # Padded lanes of h are exactly zero, so the plain sum equals the true sum.
    mu = jnp.sum(h, axis=-1, keepdims=True) * inv_n
    d = h - mu
    var = jnp.sum(jnp.where(valid, d * d, 0.0), axis=-1, keepdims=True) * inv_n
    return d * jax.lax.rsqrt(var + LN_EPS) * gamma + beta


def _critic_kernel(x_ref, a_ref, w1_ref, w2x_ref, w2a_ref, vec_ref, out_ref, *,
                   hidden_true):
    h_pad = w1_ref.shape[1]

    # Packed per-feature vectors: one (8, H_pad) slab, one DMA.
    b1, g1, be1 = vec_ref[0:1, :], vec_ref[1:2, :], vec_ref[2:3, :]
    b2, g2, be2 = vec_ref[3:4, :], vec_ref[4:5, :], vec_ref[5:6, :]
    wv = vec_ref[6:7, :]          # (1, H_pad) V weight row (zero-padded)
    bv = vec_ref[7:8, 0:1]        # (1, 1)     V bias

    lane = jax.lax.broadcasted_iota(jnp.int32, (1, h_pad), 1)
    valid = lane < hidden_true

    x = x_ref[...]
    a = a_ref[...]

    # ---- linear1 (MXU) -> LayerNorm -> ReLU   (epilogue in f32) -----------
    h1 = jnp.dot(x, w1_ref[...], preferred_element_type=jnp.float32) + b1
    h1 = _masked_layernorm(h1, g1, be1, valid, hidden_true)
    h1 = jnp.maximum(h1, 0.0)

    # ---- linear2 over cat([h1, a]) == h1 @ W2x + a @ W2a ------------------
    acc = jnp.dot(h1.astype(w2x_ref.dtype), w2x_ref[...],
                  preferred_element_type=jnp.float32)
    acc = acc + jnp.dot(a, w2a_ref[...], preferred_element_type=jnp.float32)
    acc = acc + b2
    h2 = _masked_layernorm(acc, g2, be2, valid, hidden_true)
    h2 = jnp.maximum(h2, 0.0)

    # ---- value head: VPU multiply + lane reduce, lane-dense (1, TB) row ---
    v = jnp.sum(h2 * wv, axis=-1)                     # (TB,)
    out_ref[...] = (v[None, :] + bv).astype(out_ref.dtype)


# ---------------------------------------------------------------------------
# Parameter packing (offline, once)
# ---------------------------------------------------------------------------
def pack_critic_params(params, *, lane=_LANE):
    """Zero-pad hidden to a multiple of 128 lanes and pack the small vectors
    (biases, LN gains/shifts, V weight row, V bias) into one (8, H_pad) slab.
    Returns (packed_dict, hidden_size)."""
    num_inputs, hidden = params["w1"].shape
    h_pad = _round_up(hidden, lane)
    pad = h_pad - hidden

    def pad_cols(w):
        return jnp.pad(w.astype(jnp.float32), ((0, 0), (0, pad)))

    def row(v):
        return jnp.pad(v.astype(jnp.float32).reshape(1, hidden),
                       ((0, 0), (0, pad)))

    w1 = pad_cols(params["w1"])
    w2x = jnp.pad(params["w2x"].astype(jnp.float32), ((0, pad), (0, pad)))
    w2a = pad_cols(params["w2a"])

    vec = jnp.concatenate(
        [row(params["b1"]), row(params["g1"]), row(params["be1"]),
         row(params["b2"]), row(params["g2"]), row(params["be2"]),
         row(params["wv"]),
         jnp.full((1, h_pad), params["bv"].reshape(()), dtype=jnp.float32)],
        axis=0)                                        # (8, H_pad)

    return {"w1": w1, "w2x": w2x, "w2a": w2a, "vec": vec}, hidden


# ---------------------------------------------------------------------------
# Wrapper
# ---------------------------------------------------------------------------
@functools.partial(
    jax.jit,
    static_argnames=("hidden", "block_batch", "compute_dtype",
                     "vmem_limit_bytes"))
def critic_forward(x, actions, packed, *, hidden, block_batch=128,
                   compute_dtype=jnp.float32, vmem_limit_bytes=None):
    # block_batch: use >=512 for real RL batch sizes (per-step overhead ~0.35us);
    # on v7x re-derive so 2x double-buffered activation tiles + weights fit the
    # smaller 64 MiB VMEM (or pass vmem_limit_bytes explicitly).
    assert block_batch % _LANE == 0, "block_batch must be a multiple of 128"
    B, num_inputs = x.shape
    action_space = actions.shape[1]
    w1, w2x, w2a, vec = packed["w1"], packed["w2x"], packed["w2a"], packed["vec"]
    h_pad = w1.shape[1]

    tb = block_batch
    b_pad = _round_up(B, tb)

    cdt = jnp.dtype(compute_dtype)
    xp = jnp.zeros((b_pad, num_inputs), cdt).at[:B, :].set(x.astype(cdt))
    ap = jnp.zeros((b_pad, action_space), cdt).at[:B, :].set(actions.astype(cdt))
    w1c, w2xc, w2ac = w1.astype(cdt), w2x.astype(cdt), w2a.astype(cdt)

    grid = (b_pad // tb,)
    kernel = functools.partial(_critic_kernel, hidden_true=hidden)

    flops = 2 * b_pad * h_pad * (num_inputs + h_pad + action_space + 1)
    bytes_accessed = (xp.size * xp.dtype.itemsize + ap.size * ap.dtype.itemsize
                      + w1c.size * cdt.itemsize + w2xc.size * cdt.itemsize
                      + w2ac.size * cdt.itemsize
                      + vec.size * vec.dtype.itemsize + b_pad * 4)

    cp_kwargs = dict(dimension_semantics=("parallel",))
    if vmem_limit_bytes is not None:
        cp_kwargs["vmem_limit_bytes"] = vmem_limit_bytes

    out_row = pl.pallas_call(
        kernel,
        out_shape=jax.ShapeDtypeStruct((1, b_pad), jnp.float32),
        grid_spec=pltpu.PrefetchScalarGridSpec(
            num_scalar_prefetch=0,
            grid=grid,
            in_specs=[
                pl.BlockSpec((tb, num_inputs), lambda i: (i, 0)),       # x tile
                pl.BlockSpec((tb, action_space), lambda i: (i, 0)),     # a tile
                pl.BlockSpec((num_inputs, h_pad), lambda i: (0, 0)),    # W1
                pl.BlockSpec((h_pad, h_pad), lambda i: (0, 0)),         # W2x
                pl.BlockSpec((action_space, h_pad), lambda i: (0, 0)),  # W2a
                pl.BlockSpec((8, h_pad), lambda i: (0, 0)),             # vec slab
            ],
            out_specs=pl.BlockSpec((1, tb), lambda i: (0, i)),          # lane-dense
        ),
        compiler_params=pltpu.CompilerParams(**cp_kwargs),
        cost_estimate=pl.CostEstimate(flops=flops,
                                      transcendentals=2 * b_pad,
                                      bytes_accessed=bytes_accessed),
    )(xp, ap, w1c, w2xc, w2ac, vec)

    return out_row[0, :B][:, None]                    # (B, 1)


# ---------------------------------------------------------------------------
# Init + pure-JAX reference (PyTorch semantics)
# ---------------------------------------------------------------------------
def init_params(key, num_inputs, hidden_size, action_space):
    ks = jax.random.split(key, 7)

    def unif(k, shape, fan_in):
        bound = 1.0 / jnp.sqrt(jnp.float32(fan_in))
        return jax.random.uniform(k, shape, jnp.float32, -bound, bound)

    return {
        "w1": unif(ks[0], (num_inputs, hidden_size), num_inputs),
        "b1": unif(ks[1], (hidden_size,), num_inputs),
        "g1": jnp.ones((hidden_size,), jnp.float32),
        "be1": jnp.zeros((hidden_size,), jnp.float32),
        "w2x": unif(ks[2], (hidden_size, hidden_size), hidden_size + action_space),
        "w2a": unif(ks[3], (action_space, hidden_size), hidden_size + action_space),
        "b2": unif(ks[4], (hidden_size,), hidden_size + action_space),
        "g2": jnp.ones((hidden_size,), jnp.float32),
        "be2": jnp.zeros((hidden_size,), jnp.float32),
        "wv": unif(ks[5], (hidden_size, 1), hidden_size) * 0.1,   # V.weight.mul_(0.1)
        "bv": unif(ks[6], (1,), hidden_size) * 0.1,               # V.bias.mul_(0.1)
    }


def critic_reference(x, actions, params):
    """Pure-JAX reference mirroring the PyTorch forward (full f32)."""
    hp = jax.lax.Precision.HIGHEST

    def ln(h, g, b):
        mu = jnp.mean(h, axis=-1, keepdims=True)
        var = jnp.mean(jnp.square(h - mu), axis=-1, keepdims=True)
        return (h - mu) * jax.lax.rsqrt(var + LN_EPS) * g + b

    h1 = jnp.dot(x, params["w1"], precision=hp) + params["b1"]
    h1 = jnp.maximum(ln(h1, params["g1"], params["be1"]), 0.0)
    cat = jnp.concatenate([h1, actions], axis=1)
    w2 = jnp.concatenate([params["w2x"], params["w2a"]], axis=0)
    h2 = jnp.dot(cat, w2, precision=hp) + params["b2"]
    h2 = jnp.maximum(ln(h2, params["g2"], params["be2"]), 0.0)
    return jnp.dot(h2, params["wv"], precision=hp) + params["bv"]


if __name__ == "__main__":
    B = 8            # batch
    NUM_INPUTS = 16  # state dim
    HIDDEN = 32      # hidden_size
    ACTIONS = 4      # action_space

    key = jax.random.PRNGKey(0)
    kx, ka, kp = jax.random.split(key, 3)
    x = jax.random.normal(kx, (B, NUM_INPUTS), jnp.float32)
    actions = jax.random.normal(ka, (B, ACTIONS), jnp.float32)
    params = init_params(kp, NUM_INPUTS, HIDDEN, ACTIONS)

    packed, hidden = pack_critic_params(params)
    v_ref = critic_reference(x, actions, params)

    # f32 matmul path: tight check vs the PyTorch-semantics reference.
    v32 = critic_forward(x, actions, packed, hidden=hidden,
                         block_batch=128, compute_dtype=jnp.float32)
    jax.block_until_ready(v32)
    assert v32.shape == (B, 1)
    assert jnp.allclose(v32, v_ref, atol=1e-4, rtol=1e-4), "f32 mismatch vs reference"

    # bf16 matmul path (v6e/v7x MXU peak); LayerNorm / epilogue stay f32.
    vbf = critic_forward(x, actions, packed, hidden=hidden,
                         block_batch=128, compute_dtype=jnp.bfloat16)
    jax.block_until_ready(vbf)
    assert vbf.shape == (B, 1)
    assert jnp.allclose(vbf, v_ref, atol=1e-1, rtol=1e-1), "bf16 mismatch vs reference"

    print("KERNEL_OK")
</pallas_src>

<mosaic_0001>
module attributes {stable_mosaic.version = 11 : i64} {
  func.func @_critic_kernel(%arg0: i32, %arg1: memref<128x16xf32, #tpu.memory_space<vmem>>, %arg2: memref<128x4xf32, #tpu.memory_space<vmem>>, %arg3: memref<16x128xf32, #tpu.memory_space<vmem>>, %arg4: memref<128x128xf32, #tpu.memory_space<vmem>>, %arg5: memref<4x128xf32, #tpu.memory_space<vmem>>, %arg6: memref<8x128xf32, #tpu.memory_space<vmem>>, %arg7: memref<1x128xf32, #tpu.memory_space<vmem>>) attributes {dimension_semantics = [#tpu.dimension_semantics<parallel>], iteration_bounds = array<i64: 1>, scalar_prefetch = 0 : i64, scratch_operands = 0 : i64, tpu.core_type = #tpu.core_type<tc>, window_params = [{transform_indices = @transform_0, window_bounds = array<i64: 128, 16>}, {transform_indices = @transform_1, window_bounds = array<i64: 128, 4>}, {pipeline_mode = #tpu.pipeline_mode<synchronous>, transform_indices = @transform_2, window_bounds = array<i64: 16, 128>}, {pipeline_mode = #tpu.pipeline_mode<synchronous>, transform_indices = @transform_3, window_bounds = array<i64: 128, 128>}, {pipeline_mode = #tpu.pipeline_mode<synchronous>, transform_indices = @transform_4, window_bounds = array<i64: 4, 128>}, {pipeline_mode = #tpu.pipeline_mode<synchronous>, transform_indices = @transform_5, window_bounds = array<i64: 8, 128>}, {transform_indices = @transform_6, window_bounds = array<i64: 1, 128>}]} {
    %c0 = arith.constant 0 : index
    %c0_0 = arith.constant 0 : index
    %0 = vector.load %arg6[%c0, %c0_0] : memref<8x128xf32, #tpu.memory_space<vmem>>, vector<1x128xf32>
    %c1 = arith.constant 1 : index
    %c0_1 = arith.constant 0 : index
    %1 = vector.load %arg6[%c1, %c0_1] : memref<8x128xf32, #tpu.memory_space<vmem>>, vector<1x128xf32>
    %c2 = arith.constant 2 : index
    %c0_2 = arith.constant 0 : index
    %2 = vector.load %arg6[%c2, %c0_2] : memref<8x128xf32, #tpu.memory_space<vmem>>, vector<1x128xf32>
    %c3 = arith.constant 3 : index
    %c0_3 = arith.constant 0 : index
    %3 = vector.load %arg6[%c3, %c0_3] : memref<8x128xf32, #tpu.memory_space<vmem>>, vector<1x128xf32>
    %c4 = arith.constant 4 : index
    %c0_4 = arith.constant 0 : index
    %4 = vector.load %arg6[%c4, %c0_4] : memref<8x128xf32, #tpu.memory_space<vmem>>, vector<1x128xf32>
    %c5 = arith.constant 5 : index
    %c0_5 = arith.constant 0 : index
    %5 = vector.load %arg6[%c5, %c0_5] : memref<8x128xf32, #tpu.memory_space<vmem>>, vector<1x128xf32>
    %c6 = arith.constant 6 : index
    %c0_6 = arith.constant 0 : index
    %6 = vector.load %arg6[%c6, %c0_6] : memref<8x128xf32, #tpu.memory_space<vmem>>, vector<1x128xf32>
    %c7 = arith.constant 7 : index
    %c0_7 = arith.constant 0 : index
    %7 = vector.load %arg6[%c7, %c0_7] : memref<8x128xf32, #tpu.memory_space<vmem>>, vector<1x1xf32>
    %8 = tpu.iota {dimensions = array<i32: 1>} : vector<1x128xi32>
    %c32_i32 = arith.constant 32 : i32
    %9 = vector.broadcast %c32_i32 : i32 to vector<1x128xi32>
    %10 = arith.cmpi slt, %8, %9 : vector<1x128xi32>
    %c0_8 = arith.constant 0 : index
    %c0_9 = arith.constant 0 : index
    %11 = vector.load %arg1[%c0_8, %c0_9] : memref<128x16xf32, #tpu.memory_space<vmem>>, vector<128x16xf32>
    %c0_10 = arith.constant 0 : index
    %c0_11 = arith.constant 0 : index
    %12 = vector.load %arg2[%c0_10, %c0_11] : memref<128x4xf32, #tpu.memory_space<vmem>>, vector<128x4xf32>
    %c0_12 = arith.constant 0 : index
    %c0_13 = arith.constant 0 : index
    %13 = vector.load %arg3[%c0_12, %c0_13] : memref<16x128xf32, #tpu.memory_space<vmem>>, vector<16x128xf32>
    %cst = arith.constant dense<0.000000e+00> : vector<128x128xf32>
    %14 = tpu.matmul %11, %13, %cst {dimension_numbers = #tpu.dot_dimension_numbers<[1], [0], [0], [1], [0, 0, 1, 1], [], []>} : vector<128x16xf32>, vector<16x128xf32>, vector<128x128xf32> -> vector<128x128xf32>
    %15 = vector.broadcast %0 : vector<1x128xf32> to vector<128x128xf32>
    %16 = arith.addf %14, %15 : vector<128x128xf32>
    %cst_14 = arith.constant dense<0.000000e+00> : vector<128xf32>
    %17 = vector.multi_reduction <add>, %16, %cst_14 [1] : vector<128x128xf32> to vector<128xf32>
    %18 = vector.shape_cast %17 : vector<128xf32> to vector<128x1xf32>
    %cst_15 = arith.constant 3.125000e-02 : f32
    %19 = vector.broadcast %cst_15 : f32 to vector<128x1xf32>
    %20 = arith.mulf %18, %19 : vector<128x1xf32>
    %21 = vector.broadcast %20 : vector<128x1xf32> to vector<128x128xf32>
    %22 = arith.subf %16, %21 : vector<128x128xf32>
    %23 = arith.mulf %22, %22 : vector<128x128xf32>
    %cst_16 = arith.constant 0.000000e+00 : f32
    %24 = vector.shape_cast %10 : vector<1x128xi1> to vector<1x128xi1>
    %25 = vector.broadcast %24 : vector<1x128xi1> to vector<128x128xi1>
    %26 = vector.broadcast %cst_16 : f32 to vector<128x128xf32>
    %27 = arith.select %25, %23, %26 : vector<128x128xi1>, vector<128x128xf32>
    %cst_17 = arith.constant dense<0.000000e+00> : vector<128xf32>
    %28 = vector.multi_reduction <add>, %27, %cst_17 [1] : vector<128x128xf32> to vector<128xf32>
    %29 = vector.shape_cast %28 : vector<128xf32> to vector<128x1xf32>
    %cst_18 = arith.constant 3.125000e-02 : f32
    %30 = vector.broadcast %cst_18 : f32 to vector<128x1xf32>
    %31 = arith.mulf %29, %30 : vector<128x1xf32>
    %cst_19 = arith.constant 9.99999974E-6 : f32
    %32 = vector.broadcast %cst_19 : f32 to vector<128x1xf32>
    %33 = arith.addf %31, %32 : vector<128x1xf32>
    %34 = math.rsqrt %33 : vector<128x1xf32>
    %35 = vector.broadcast %34 : vector<128x1xf32> to vector<128x128xf32>
    %36 = arith.mulf %22, %35 : vector<128x128xf32>
    %37 = vector.broadcast %1 : vector<1x128xf32> to vector<128x128xf32>
    %38 = arith.mulf %36, %37 : vector<128x128xf32>
    %39 = vector.broadcast %2 : vector<1x128xf32> to vector<128x128xf32>
    %40 = arith.addf %38, %39 : vector<128x128xf32>
    %cst_20 = arith.constant 0.000000e+00 : f32
    %41 = vector.broadcast %cst_20 : f32 to vector<128x128xf32>
    %42 = arith.maximumf %40, %41 : vector<128x128xf32>
    %c0_21 = arith.constant 0 : index
    %c0_22 = arith.constant 0 : index
    %43 = vector.load %arg4[%c0_21, %c0_22] : memref<128x128xf32, #tpu.memory_space<vmem>>, vector<128x128xf32>
    %cst_23 = arith.constant dense<0.000000e+00> : vector<128x128xf32>
    %44 = tpu.matmul %42, %43, %cst_23 {dimension_numbers = #tpu.dot_dimension_numbers<[1], [0], [0], [1], [0, 0, 1, 1], [], []>} : vector<128x128xf32>, vector<128x128xf32>, vector<128x128xf32> -> vector<128x128xf32>
    %c0_24 = arith.constant 0 : index
    %c0_25 = arith.constant 0 : index
    %45 = vector.load %arg5[%c0_24, %c0_25] : memref<4x128xf32, #tpu.memory_space<vmem>>, vector<4x128xf32>
    %cst_26 = arith.constant dense<0.000000e+00> : vector<128x128xf32>
    %46 = tpu.matmul %12, %45, %cst_26 {dimension_numbers = #tpu.dot_dimension_numbers<[1], [0], [0], [1], [0, 0, 1, 1], [], []>} : vector<128x4xf32>, vector<4x128xf32>, vector<128x128xf32> -> vector<128x128xf32>
    %47 = arith.addf %44, %46 : vector<128x128xf32>
    %48 = vector.broadcast %3 : vector<1x128xf32> to vector<128x128xf32>
    %49 = arith.addf %47, %48 : vector<128x128xf32>
    %cst_27 = arith.constant dense<0.000000e+00> : vector<128xf32>
    %50 = vector.multi_reduction <add>, %49, %cst_27 [1] : vector<128x128xf32> to vector<128xf32>
    %51 = vector.shape_cast %50 : vector<128xf32> to vector<128x1xf32>
    %cst_28 = arith.constant 3.125000e-02 : f32
    %52 = vector.broadcast %cst_28 : f32 to vector<128x1xf32>
    %53 = arith.mulf %51, %52 : vector<128x1xf32>
    %54 = vector.broadcast %53 : vector<128x1xf32> to vector<128x128xf32>
    %55 = arith.subf %49, %54 : vector<128x128xf32>
    %56 = arith.mulf %55, %55 : vector<128x128xf32>
    %cst_29 = arith.constant 0.000000e+00 : f32
    %57 = vector.shape_cast %10 : vector<1x128xi1> to vector<1x128xi1>
    %58 = vector.broadcast %57 : vector<1x128xi1> to vector<128x128xi1>
    %59 = vector.broadcast %cst_29 : f32 to vector<128x128xf32>
    %60 = arith.select %58, %56, %59 : vector<128x128xi1>, vector<128x128xf32>
    %cst_30 = arith.constant dense<0.000000e+00> : vector<128xf32>
    %61 = vector.multi_reduction <add>, %60, %cst_30 [1] : vector<128x128xf32> to vector<128xf32>
    %62 = vector.shape_cast %61 : vector<128xf32> to vector<128x1xf32>
    %cst_31 = arith.constant 3.125000e-02 : f32
    %63 = vector.broadcast %cst_31 : f32 to vector<128x1xf32>
    %64 = arith.mulf %62, %63 : vector<128x1xf32>
    %cst_32 = arith.constant 9.99999974E-6 : f32
    %65 = vector.broadcast %cst_32 : f32 to vector<128x1xf32>
    %66 = arith.addf %64, %65 : vector<128x1xf32>
    %67 = math.rsqrt %66 : vector<128x1xf32>
    %68 = vector.broadcast %67 : vector<128x1xf32> to vector<128x128xf32>
    %69 = arith.mulf %55, %68 : vector<128x128xf32>
    %70 = vector.broadcast %4 : vector<1x128xf32> to vector<128x128xf32>
    %71 = arith.mulf %69, %70 : vector<128x128xf32>
    %72 = vector.broadcast %5 : vector<1x128xf32> to vector<128x128xf32>
    %73 = arith.addf %71, %72 : vector<128x128xf32>
    %cst_33 = arith.constant 0.000000e+00 : f32
    %74 = vector.broadcast %cst_33 : f32 to vector<128x128xf32>
    %75 = arith.maximumf %73, %74 : vector<128x128xf32>
    %76 = vector.broadcast %6 : vector<1x128xf32> to vector<128x128xf32>
    %77 = arith.mulf %75, %76 : vector<128x128xf32>
    %cst_34 = arith.constant dense<0.000000e+00> : vector<128xf32>
    %78 = vector.multi_reduction <add>, %77, %cst_34 [1] : vector<128x128xf32> to vector<128xf32>
    %79 = vector.shape_cast %78 : vector<128xf32> to vector<1x128xf32>
    %80 = vector.broadcast %7 : vector<1x1xf32> to vector<1x128xf32>
    %81 = arith.addf %79, %80 : vector<1x128xf32>
    %c0_35 = arith.constant 0 : index
    %c0_36 = arith.constant 0 : index
    %82 = vector.load %arg7[%c0_35, %c0_36] : memref<1x128xf32, #tpu.memory_space<vmem>>, vector<1x128xf32>
    tpu.vector_store %arg7[%c0_35, %c0_36], %81 {strides = array<i32>} : memref<1x128xf32, #tpu.memory_space<vmem>>, vector<1x128xf32>,
    return
  }
  func.func @transform_0(%arg0: i32) -> (i32, i32) {
    %c0_i32 = arith.constant 0 : i32
    %c0_i32_0 = arith.constant 0 : i32
    return %arg0, %c0_i32 : i32, i32
  }
  func.func @transform_1(%arg0: i32) -> (i32, i32) {
    %c0_i32 = arith.constant 0 : i32
    %c0_i32_0 = arith.constant 0 : i32
    return %arg0, %c0_i32 : i32, i32
  }
  func.func @transform_2(%arg0: i32) -> (i32, i32) {
    %c0_i32 = arith.constant 0 : i32
    %c0_i32_0 = arith.constant 0 : i32
    %c0_i32_1 = arith.constant 0 : i32
    return %c0_i32, %c0_i32_0 : i32, i32
  }
  func.func @transform_3(%arg0: i32) -> (i32, i32) {
    %c0_i32 = arith.constant 0 : i32
    %c0_i32_0 = arith.constant 0 : i32
    %c0_i32_1 = arith.constant 0 : i32
    return %c0_i32, %c0_i32_0 : i32, i32
  }
  func.func @transform_4(%arg0: i32) -> (i32, i32) {
    %c0_i32 = arith.constant 0 : i32
    %c0_i32_0 = arith.constant 0 : i32
    %c0_i32_1 = arith.constant 0 : i32
    return %c0_i32, %c0_i32_0 : i32, i32
  }
  func.func @transform_5(%arg0: i32) -> (i32, i32) {
    %c0_i32 = arith.constant 0 : i32
    %c0_i32_0 = arith.constant 0 : i32
    %c0_i32_1 = arith.constant 0 : i32
    return %c0_i32, %c0_i32_0 : i32, i32
  }
  func.func @transform_6(%arg0: i32) -> (i32, i32) {
    %c0_i32 = arith.constant 0 : i32
    %c0_i32_0 = arith.constant 0 : i32
    return %c0_i32, %arg0 : i32, i32
  }
}

</mosaic_0001>

<bundles_post_ra>
// kernel: critic_forward.1
= control target key start
LH: loop header
LB: loop body
LE: loop exit
PB: predicated region body
PF: predicated region fallthrough
CT: control target
= control target key end

     0   :  { %vm72_vm0 = vcmask 130048   ;;  %v31_v55 = vlaneseq  ;;  %vm582_vm2 = vcmask 1043456   ;;  %vm533_vm3 = vcmask 31744   ;;  %s2468_s2 = inlined_call_operand.vmem [shape: f32[16,128], index: 2, kind: input, shape index: {}]   ;;  %s2469_s0 = inlined_call_operand.vmem [shape: f32[128,16], index: 0, kind: input, shape index: {}]   ;;  %s2470_s5 = inlined_call_operand.vmem [shape: f32[8,128], index: 5, kind: input, shape index: {}]   ;;  %s2471_s3 = inlined_call_operand.vmem [shape: f32[128,128], index: 3, kind: input, shape index: {}]   ;;  %s2472_s4 = inlined_call_operand.vmem [shape: f32[4,128], index: 4, kind: input, shape index: {}]   ;;  %s2473_s1 = inlined_call_operand.vmem [shape: f32[128,4], index: 1, kind: input, shape index: {}]   ;;  %s2474_s6 = inlined_call_operand.vmem [shape: f32[1,128], index: 6, kind: output, shape index: {}]  }
   0x1   :  { %v66_v0 = vld [vmem:[%s2468_s2] sm:$0xff]  ;;  %v67_v1 = vld [vmem:[%s2468_s2 + $0x8] sm:$0xff]  ;;  %v36_v5 = vld [vmem:[%s2469_s0 + $0x10] sm:$0xff]  ;;  %vm1294_vm4 = vcmask 130112   ;;  %vm1301_vm5 = vcmask 195712   ;;  %vm1308_vm6 = vcmask 261312  }
   0x2   :  { %v34_v2 = vld [vmem:[%s2469_s0] sm:$0xff]  ;;  %v1617_v3 = vpack.c.bf16 %v67_v1, %v66_v0  ;;  %v35_v4 = vld [vmem:[%s2469_s0 + $0x8] sm:$0xff]  ;;  %v37_v6 = vld [vmem:[%s2469_s0 + $0x18] sm:$0xff]  ;;  %v1914_v57 = vand.u32 127, %v31_v55  ;;  %vm1315_vm7 = vcmask 326912   ;;  %vm1322_vm8 = vcmask 392512  }
   0x3   :  { %1511 = vmatprep.mubr.msk.f32.mxu0 %vm72_vm0, %v34_v2  ;;  %v38_v7 = vld [vmem:[%s2469_s0 + $0x20] sm:$0xff]  ;;  %v39_v8 = vld [vmem:[%s2469_s0 + $0x28] sm:$0xff]  ;;  %v40_v9 = vld [vmem:[%s2469_s0 + $0x30] sm:$0xff]  ;;  %vm1329_vm9 = vcmask 458112   ;;  %vm1336_vm10 = vcmask 523712   ;;  %vm1343_vm11 = vcmask 589312  }
   0x4   :  { %1618 = vmatprep.subr.bf16.mxu0 %v1617_v3  ;;  %v41_v10 = vld [vmem:[%s2469_s0 + $0x38] sm:$0xff]  ;;  %v42_v11 = vld [vmem:[%s2469_s0 + $0x40] sm:$0xff]  ;;  %v43_v12 = vld [vmem:[%s2469_s0 + $0x48] sm:$0xff]  ;;  %vm33_vm1 = vcmp.lt.s32.totalorder %v1914_v57, 32  ;;  %vm1350_vm12 = vcmask 654912   ;;  %vm1357_vm13 = vcmask 720512  }
   0x5   :  { %1620 = vmatpush3.bf16.msra.mxu0 %v1617_v3  ;;  %v44_v13 = vld [vmem:[%s2469_s0 + $0x50] sm:$0xff]  ;;  %v45_v14 = vld [vmem:[%s2469_s0 + $0x58] sm:$0xff]  ;;  %v46_v15 = vld [vmem:[%s2469_s0 + $0x60] sm:$0xff]  ;;  %vm1364_vm14 = vcmask 786112   ;;  %vm1371_vm15 = vcmask 851712  }
   0x6   :  { %v47_v16 = vld [vmem:[%s2469_s0 + $0x68] sm:$0xff]  ;;  %v48_v17 = vld [vmem:[%s2469_s0 + $0x70] sm:$0xff]  ;;  %v49_v18 = vld [vmem:[%s2469_s0 + $0x78] sm:$0xff] }
   0x7   :  { %v1400_v19 = vld [vmem:[%s2470_s5] ss:$0 sm:$0xff]  ;;  %v517_v53 = vld [vmem:[%s2471_s3 + $0x8] sm:$0xff] }
   0x8   :  { %1512 = vmatmul.mubr.msk.f32.vlgmr.msra.gmra.mrb[0].mxu0 %vm72_vm0, %v35_v4  ;;  %v516_v52 = vld [vmem:[%s2471_s3] sm:$0xff] }
   0x9   :  { %1514 = vmatprep.mubr.msk.f32.mxu0 %vm72_vm0, %v36_v5  ;;  %v1909_v54 = vpack.c.bf16 %v517_v53, %v516_v52 }
   0xb   :  { %1622 = vmatprep.subr.bf16.mxu0 %v1909_v54 }
   0xc   :  { %1515 = vmatmul.mubr.msk.f32.gmra.mrb[2].mxu0 %vm72_vm0, %v37_v6 }
   0xd   :  { %1517 = vmatprep.mubr.msk.f32.mxu0 %vm72_vm0, %v38_v7  ;;  %1624 = vmatpush3.bf16.msra.mxu0 %v1909_v54 }
  0x10   :  { %1518 = vmatmul.mubr.msk.f32.gmra.mrb[4].mxu0 %vm72_vm0, %v39_v8 }
  0x11   :  { %1520 = vmatprep.mubr.msk.f32.mxu0 %vm72_vm0, %v40_v9 }
  0x14   :  { %1521 = vmatmul.mubr.msk.f32.gmra.mrb[6].mxu0 %vm72_vm0, %v41_v10 }
  0x15   :  { %1523 = vmatprep.mubr.msk.f32.mxu0 %vm72_vm0, %v42_v11 }
  0x18   :  { %1524 = vmatmul.mubr.msk.f32.gmra.mrb[8].mxu0 %vm72_vm0, %v43_v12 }
  0x19   :  { %1526 = vmatprep.mubr.msk.f32.mxu0 %vm72_vm0, %v44_v13 }
  0x1c   :  { %1527 = vmatmul.mubr.msk.f32.gmra.mrb[10].mxu0 %vm72_vm0, %v45_v14 }
  0x1d   :  { %1529 = vmatprep.mubr.msk.f32.mxu0 %vm72_vm0, %v46_v15 }
  0x20   :  { %1530 = vmatmul.mubr.msk.f32.gmra.mrb[12].mxu0 %vm72_vm0, %v47_v16 }
  0x21   :  { %1532 = vmatprep.mubr.msk.f32.mxu0 %vm72_vm0, %v48_v17 }
  0x24   :  { %1533 = vmatmul.mubr.msk.f32.gmra.mrb[14].mxu0 %vm72_vm0, %v49_v18  ;;  %vm1378_vm0 = vcmask 917312  }
  0xdb   :  { %v1513_v20 = vpop.f32.mrb[0].mxu0 }
  0xdc   :  { %v193_v21 = vadd.f32 %v1513_v20, %v1400_v19  ;;  %v187_v22 = vpop.f32.mrb[1].mxu0 }
  0xdd   :  { %v188_v24 = vadd.f32 %v1400_v19, %v187_v22 }
  0xde   :  { %268 = vadd.xlane.f32.xlu0 %v193_v21 }
  0xdf   :  { %v1516_v23 = vpop.f32.mrb[2].mxu0 }
  0xe0   :  { %v197_v25 = vpop.f32.mrb[3].mxu0  ;;  %v1863_v27 = vadd.f32 %v1516_v23, %v1400_v19 }
  0xe1   :  { %v1861_v26 = vadd.f32 %v1400_v19, %v197_v25 }
  0xe2   :  { %266 = vadd.xlane.f32.xlu0 %v188_v24 }
  0xe3   :  { %270 = vadd.xlane.f32.xlu1 %v1861_v26  ;;  %v1519_v28 = vpop.f32.mrb[4].mxu0 }
  0xe4   :  { %v207_v29 = vpop.f32.mrb[5].mxu0  ;;  %v1866_v30 = vadd.f32 %v1519_v28, %v1400_v19  ;;  %v518_v28 = vld [vmem:[%s2471_s3 + $0x10] sm:$0xff] }
  0xe5   :  { %v1871_v34 = vadd.f32 %v1400_v19, %v207_v29  ;;  %v519_v29 = vld [vmem:[%s2471_s3 + $0x18] sm:$0xff] }
  0xe6   :  { %272 = vadd.xlane.f32.xlu0 %v1863_v27 }
  0xe7   :  { %v1522_v31 = vpop.f32.mrb[6].mxu0 }
  0xe8   :  { %v1869_v32 = vadd.f32 %v1522_v31, %v1400_v19  ;;  %v217_v33 = vpop.f32.mrb[7].mxu0  ;;  %v1967_v31 = vpack.c.bf16 %v519_v29, %v518_v28 }
  0xe9   :  { %v1875_v35 = vadd.f32 %v1400_v19, %v217_v33 }
  0xea   :  { %280 = vadd.xlane.f32.xlu1 %v1869_v32  ;;  %276 = vadd.xlane.f32.xlu0 %v1866_v30 }
  0xeb   :  { %v1525_v36 = vpop.f32.mrb[8].mxu0  ;;  %1626 = vmatprep.subr.bf16.mxu0 %v1967_v31 }
  0xec   :  { %v227_v37 = vpop.f32.mrb[9].mxu0  ;;  %v1883_v42 = vadd.f32 %v1525_v36, %v1400_v19  ;;  %1628 = vmatpush3.bf16.msra.mxu0 %v1967_v31 }
  0xed   :  { %v1877_v38 = vadd.f32 %v1400_v19, %v227_v37 }
  0xee   :  { %278 = vadd.xlane.f32.xlu1 %v1875_v35  ;;  %274 = vadd.xlane.f32.xlu0 %v1871_v34 }
  0xef   :  { %v1528_v39 = vpop.f32.mrb[10].mxu0 }
  0xf0   :  { %v237_v40 = vpop.f32.mrb[11].mxu0  ;;  %v1889_v46 = vadd.f32 %v1528_v39, %v1400_v19 }
  0xf1   :  { %v1881_v41 = vadd.f32 %v1400_v19, %v237_v40 }
  0xf2   :  { %282 = vadd.xlane.f32.xlu1 %v1877_v38 }
  0xf3   :  { %v1531_v43 = vpop.f32.mrb[12].mxu0  ;;  %286 = vadd.xlane.f32.xlu0 %v1881_v41 }
  0xf4   :  { %v247_v44 = vpop.f32.mrb[13].mxu0  ;;  %v1895_v50 = vadd.f32 %v1531_v43, %v1400_v19  ;;  %v520_v43 = vld [vmem:[%s2471_s3 + $0x20] sm:$0xff] }
  0xf5   :  { %v1887_v45 = vadd.f32 %v1400_v19, %v247_v44  ;;  %v521_v44 = vld [vmem:[%s2471_s3 + $0x28] sm:$0xff] }
  0xf6   :  { %284 = vadd.xlane.f32.xlu1 %v1883_v42 }
  0xf7   :  { %v1534_v47 = vpop.f32.mrb[14].mxu0  ;;  %290 = vadd.xlane.f32.xlu0 %v1887_v45 }
  0xf8   :  { %v257_v48 = vpop.f32.mrb[15].mxu0  ;;  %v1899_v51 = vadd.f32 %v1534_v47, %v1400_v19 }
  0xf9   :  { %v1893_v49 = vadd.f32 %v1400_v19, %v257_v48  ;;  %v1991_v48 = vpack.c.bf16 %v521_v44, %v520_v43  ;;  %v528_v44 = vld [vmem:[%s2471_s3 + $0x60] sm:$0xff] }
  0xfa   :  { %288 = vadd.xlane.f32.xlu1 %v1889_v46 }
  0xfb   :  { %294 = vadd.xlane.f32.xlu0 %v1893_v49  ;;  %1630 = vmatprep.subr.bf16.mxu0 %v1991_v48 }
  0xfc   :  { %1632 = vmatpush3.bf16.msra.mxu0 %v1991_v48 }
  0xfe   :  { %292 = vadd.xlane.f32.xlu1 %v1895_v50 }
 0x102   :  { %296 = vadd.xlane.f32.xlu1 %v1899_v51 }
 0x16b   :  { %v269_v56 = vpop.xlane.xlu0 %268 }
 0x16c   :  { %v299_v58 = vmul.f32 0.03125, %v269_v56 }
 0x16e   :  { %v1916_v59 = vsub.f32 %v193_v21, %v299_v58 }
 0x16f   :  { %v267_v60 = vpop.xlane.xlu0 %266 }
 0x170   :  { %v298_v61 = vmul.f32 0.03125, %v267_v60  ;;  %v271_v62 = vpop.xlane.xlu1 %270  ;;  %v331_v63 = vmul.f32 %v1916_v59, %v1916_v59 }
 0x171   :  { %v300_v0 = vmul.f32 0.03125, %v271_v62 }
 0x172   :  { %v1921_v1 = vsub.f32 %v188_v24, %v298_v61  ;;  %v349_v2 = vsel %vm33_vm1, %v331_v63, 0.0  ;;  %v532_v63 = vld [vmem:[%s2472_s4] sm:$0xf] }
 0x173   :  { %366 = vadd.xlane.f32.xlu1 %v349_v2  ;;  %v273_v3 = vpop.xlane.xlu0 %272  ;;  %v1928_v6 = vsub.f32 %v1861_v26, %v300_v0  ;;  %v522_v0 = vld [vmem:[%s2471_s3 + $0x30] sm:$0xff]  ;;  %1535 = vmatprep.subr.msk.mxu1 %vm582_vm2, %v532_v63 }
 0x174   :  { %v301_v4 = vmul.f32 0.03125, %v273_v3  ;;  %v330_v5 = vmul.f32 %v1921_v1, %v1921_v1  ;;  %1536 = vmatpush3.msk.msra.mxu1 %vm582_vm2, %v532_v63  ;;  %v59_v63 = vld [vmem:[%s2473_s1 + $0x48] sm:$0xff]  ;;  %vm1392_vm2 = vcmask 1048512  }
 0x175   :  { %v332_v14 = vmul.f32 %v1928_v6, %v1928_v6  ;;  %1653 = vmatprep.subr.bf16.mxu1 %v1909_v54 }
 0x176   :  { %v1931_v7 = vsub.f32 %v1863_v27, %v301_v4  ;;  %v348_v8 = vsel %vm33_vm1, %v330_v5, 0.0  ;;  %v50_v4 = vld [vmem:[%s2473_s1] sm:$0xff] }
 0x177   :  { %v281_v9 = vpop.xlane.xlu1 %280  ;;  %364 = vadd.xlane.f32.xlu0 %v348_v8  ;;  %v277_v10 = vpop.xlane.xlu0 %276  ;;  %v350_v23 = vsel %vm33_vm1, %v332_v14, 0.0  ;;  %1537 = vmatprep.mubr.msk.f32.mxu1 %vm533_vm3, %v50_v4  ;;  %v63_v4 = vld [vmem:[%s2473_s1 + $0x68] sm:$0xff] }
 0x178   :  { %v305_v11 = vmul.f32 0.03125, %v281_v9  ;;  %v303_v12 = vmul.f32 0.03125, %v277_v10  ;;  %v333_v13 = vmul.f32 %v1931_v7, %v1931_v7 }
 0x17a   :  { %v1940_v15 = vsub.f32 %v1869_v32, %v305_v11  ;;  %v1943_v16 = vsub.f32 %v1866_v30, %v303_v12  ;;  %v351_v17 = vsel %vm33_vm1, %v333_v13, 0.0 }
 0x17b   :  { %v279_v18 = vpop.xlane.xlu1 %278  ;;  %370 = vadd.xlane.f32.xlu0 %v351_v17  ;;  %v275_v19 = vpop.xlane.xlu0 %274 }
 0x17c   :  { %v304_v20 = vmul.f32 0.03125, %v279_v18  ;;  %v302_v21 = vmul.f32 0.03125, %v275_v19  ;;  %v337_v22 = vmul.f32 %v1940_v15, %v1940_v15  ;;  %v335_v27 = vmul.f32 %v1943_v16, %v1943_v16 }
 0x17e   :  { %v1952_v24 = vsub.f32 %v1875_v35, %v304_v20  ;;  %v1955_v25 = vsub.f32 %v1871_v34, %v302_v21  ;;  %v355_v26 = vsel %vm33_vm1, %v337_v22, 0.0  ;;  %v353_v40 = vsel %vm33_vm1, %v335_v27, 0.0  ;;  %v524_v20 = vld [vmem:[%s2471_s3 + $0x40] sm:$0xff]  ;;  %v525_v21 = vld [vmem:[%s2471_s3 + $0x48] sm:$0xff] }
 0x17f   :  { %378 = vadd.xlane.f32.xlu1 %v355_v26  ;;  %v283_v30 = vpop.xlane.xlu1 %282  ;;  %368 = vadd.xlane.f32.xlu0 %v350_v23  ;;  %v1637_v23 = vpack.c.bf16 %v525_v21, %v524_v20  ;;  %v53_v26 = vld [vmem:[%s2473_s1 + $0x18] sm:$0xff] }
 0x180   :  { %v306_v32 = vmul.f32 0.03125, %v283_v30  ;;  %v287_v33 = vpop.xlane.xlu0 %286  ;;  %v336_v34 = vmul.f32 %v1952_v24, %v1952_v24  ;;  %v334_v36 = vmul.f32 %v1955_v25, %v1955_v25 }
 0x181   :  { %v308_v35 = vmul.f32 0.03125, %v287_v33 }
 0x182   :  { %v1975_v37 = vsub.f32 %v1877_v38, %v306_v32  ;;  %v354_v39 = vsel %vm33_vm1, %v336_v34, 0.0  ;;  %v352_v60 = vsel %vm33_vm1, %v334_v36, 0.0  ;;  %v527_v32 = vld [vmem:[%s2471_s3 + $0x58] sm:$0xff] }
 0x183   :  { %v1989_v47 = vsub.f32 %v1881_v41, %v308_v35  ;;  %376 = vadd.xlane.f32.xlu1 %v354_v39  ;;  %v285_v38 = vpop.xlane.xlu1 %284  ;;  %374 = vadd.xlane.f32.xlu0 %v353_v40  ;;  %v54_v35 = vld [vmem:[%s2473_s1 + $0x20] sm:$0xff]  ;;  %v55_v39 = vld [vmem:[%s2473_s1 + $0x28] sm:$0xff] }
 0x184   :  { %v307_v52 = vmul.f32 0.03125, %v285_v38  ;;  %v291_v53 = vpop.xlane.xlu0 %290  ;;  %v338_v56 = vmul.f32 %v1975_v37, %v1975_v37 }
 0x185   :  { %v310_v58 = vmul.f32 0.03125, %v291_v53  ;;  %v340_v62 = vmul.f32 %v1989_v47, %v1989_v47 }
 0x186   :  { %v1999_v61 = vsub.f32 %v1883_v42, %v307_v52  ;;  %v356_v41 = vsel %vm33_vm1, %v338_v56, 0.0  ;;  %v523_v42 = vld [vmem:[%s2471_s3 + $0x38] sm:$0xff]  ;;  %v56_v52 = vld [vmem:[%s2473_s1 + $0x30] sm:$0xff] }
 0x187   :  { %v2016_v2 = vsub.f32 %v1887_v45, %v310_v58  ;;  %380 = vadd.xlane.f32.xlu1 %v356_v41  ;;  %v289_v3 = vpop.xlane.xlu1 %288  ;;  %372 = vadd.xlane.f32.xlu0 %v352_v60  ;;  %v2021_v5 = vpack.c.bf16 %v523_v42, %v522_v0  ;;  %v51_v45 = vld [vmem:[%s2473_s1 + $0x8] sm:$0xff]  ;;  %v358_v14 = vsel %vm33_vm1, %v340_v62, 0.0  ;;  %v57_v56 = vld [vmem:[%s2473_s1 + $0x38] sm:$0xff]  ;;  %v58_v41 = vld [vmem:[%s2473_s1 + $0x40] sm:$0xff] }
 0x188   :  { %v309_v8 = vmul.f32 0.03125, %v289_v3  ;;  %v295_v9 = vpop.xlane.xlu0 %294  ;;  %v339_v10 = vmul.f32 %v1999_v61, %v1999_v61  ;;  %1538 = vmatmul.mubr.msk.f32.vlgmr.msra.gmra.mrb[0].mxu1 %vm533_vm3, %v51_v45  ;;  %v531_v60 = vld [vmem:[%s2471_s3 + $0x78] sm:$0xff]  ;;  %v60_v0 = vld [vmem:[%s2473_s1 + $0x50] sm:$0xff]  ;;  %v62_v3 = vld [vmem:[%s2473_s1 + $0x60] sm:$0xff] }
 0x189   :  { %v312_v11 = vmul.f32 0.03125, %v295_v9  ;;  %1634 = vmatprep.subr.bf16.mxu0 %v2021_v5  ;;  %v342_v17 = vmul.f32 %v2016_v2, %v2016_v2  ;;  %1661 = vmatpush3.bf16.msra.mxu1 %v1909_v54  ;;  %v61_v42 = vld [vmem:[%s2473_s1 + $0x58] sm:$0xff] }
 0x18a   :  { %v2033_v12 = vsub.f32 %v1889_v46, %v309_v8  ;;  %v357_v13 = vsel %vm33_vm1, %v339_v10, 0.0  ;;  %v52_v46 = vld [vmem:[%s2473_s1 + $0x10] sm:$0xff]  ;;  %1636 = vmatpush3.bf16.msra.mxu0 %v2021_v5  ;;  %1654 = vmatprep.subr.bf16.mxu1 %v1967_v31  ;;  %v65_v8 = vld [vmem:[%s2473_s1 + $0x78] sm:$0xff] }
 0x18b   :  { %v2044_v18 = vsub.f32 %v1893_v49, %v312_v11  ;;  %382 = vadd.xlane.f32.xlu1 %v357_v13  ;;  %v293_v19 = vpop.xlane.xlu1 %292  ;;  %384 = vadd.xlane.f32.xlu0 %v358_v14  ;;  %v360_v54 = vsel %vm33_vm1, %v342_v17, 0.0 }
 0x18c   :  { %v311_v22 = vmul.f32 0.03125, %v293_v19  ;;  %v341_v49 = vmul.f32 %v2033_v12, %v2033_v12  ;;  %1540 = vmatprep.mubr.msk.f32.mxu1 %vm533_vm3, %v52_v46  ;;  %1638 = vmatprep.subr.bf16.mxu0 %v1637_v23 }
 0x18d   :  { %v344_v29 = vmul.f32 %v2044_v18, %v2044_v18  ;;  %1541 = vmatmul.mubr.msk.f32.gmra.mrb[2].mxu1 %vm533_vm3, %v53_v26 }
 0x18e   :  { %v2065_v27 = vsub.f32 %v1895_v50, %v311_v22  ;;  %v359_v28 = vsel %vm33_vm1, %v341_v49, 0.0  ;;  %v526_v50 = vld [vmem:[%s2471_s3 + $0x50] sm:$0xff]  ;;  %1662 = vmatpush3.bf16.msra.mxu1 %v1967_v31  ;;  %1640 = vmatpush3.bf16.msra.mxu0 %v1637_v23 }
 0x18f   :  { %386 = vadd.xlane.f32.xlu1 %v359_v28  ;;  %v297_v30 = vpop.xlane.xlu1 %296  ;;  %388 = vadd.xlane.f32.xlu0 %v360_v54  ;;  %v1641_v36 = vpack.c.bf16 %v527_v32, %v526_v50  ;;  %v362_v43 = vsel %vm33_vm1, %v344_v29, 0.0  ;;  %v2162_v50 = vld [vmem:[%s2470_s5 + $0x1] ss:$0 sm:$0xff] }
 0x190   :  { %v313_v33 = vmul.f32 0.03125, %v297_v30  ;;  %v343_v34 = vmul.f32 %v2065_v27, %v2065_v27  ;;  %1543 = vmatprep.mubr.msk.f32.mxu1 %vm533_vm3, %v54_v35  ;;  %1655 = vmatprep.subr.bf16.mxu1 %v1991_v48 }
 0x191   :  { %1544 = vmatmul.mubr.msk.f32.gmra.mrb[4].mxu1 %vm533_vm3, %v55_v39  ;;  %1642 = vmatprep.subr.bf16.mxu0 %v1641_v36 }
 0x192   :  { %v2092_v40 = vsub.f32 %v1899_v51, %v313_v33  ;;  %v361_v31 = vsel %vm33_vm1, %v343_v34, 0.0  ;;  %v529_v51 = vld [vmem:[%s2471_s3 + $0x68] sm:$0xff]  ;;  %1663 = vmatpush3.bf16.msra.mxu1 %v1991_v48  ;;  %1644 = vmatpush3.bf16.msra.mxu0 %v1641_v36  ;;  %v530_v48 = vld [vmem:[%s2471_s3 + $0x70] sm:$0xff] }
 0x193   :  { %390 = vadd.xlane.f32.xlu1 %v361_v31  ;;  %392 = vadd.xlane.f32.xlu0 %v362_v43  ;;  %v1645_v53 = vpack.c.bf16 %v529_v51, %v528_v44  ;;  %v1649_v62 = vpack.c.bf16 %v531_v60, %v530_v48 }
 0x194   :  { %v345_v38 = vmul.f32 %v2092_v40, %v2092_v40  ;;  %1546 = vmatprep.mubr.msk.f32.mxu1 %vm533_vm3, %v56_v52  ;;  %1656 = vmatprep.subr.bf16.mxu1 %v2021_v5 }
 0x195   :  { %1547 = vmatmul.mubr.msk.f32.gmra.mrb[6].mxu1 %vm533_vm3, %v57_v56  ;;  %1646 = vmatprep.subr.bf16.mxu0 %v1645_v53 }
 0x196   :  { %v363_v58 = vsel %vm33_vm1, %v345_v38, 0.0  ;;  %1664 = vmatpush3.bf16.msra.mxu1 %v2021_v5  ;;  %1648 = vmatpush3.bf16.msra.mxu0 %v1645_v53  ;;  %v64_v5 = vld [vmem:[%s2473_s1 + $0x70] sm:$0xff] }
 0x197   :  { %394 = vadd.xlane.f32.xlu1 %v363_v58  ;;  %1549 = vmatprep.mubr.msk.f32.mxu1 %vm533_vm3, %v58_v41 }
 0x198   :  { %1657 = vmatprep.subr.bf16.mxu1 %v1637_v23  ;;  %1650 = vmatprep.subr.bf16.mxu0 %v1649_v62 }
 0x199   :  { %1550 = vmatmul.mubr.msk.f32.gmra.mrb[8].mxu1 %vm533_vm3, %v59_v63 }
 0x19a   :  { %1665 = vmatpush3.bf16.msra.mxu1 %v1637_v23  ;;  %1652 = vmatpush3.bf16.msra.mxu0 %v1649_v62 }
 0x19b   :  { %1552 = vmatprep.mubr.msk.f32.mxu1 %vm533_vm3, %v60_v0  ;;  %1658 = vmatprep.subr.bf16.mxu1 %v1641_v36 }
 0x19d   :  { %1553 = vmatmul.mubr.msk.f32.gmra.mrb[10].mxu1 %vm533_vm3, %v61_v42 }
 0x19e   :  { %1666 = vmatpush3.bf16.msra.mxu1 %v1641_v36  ;;  %1555 = vmatprep.mubr.msk.f32.mxu1 %vm533_vm3, %v62_v3 }
 0x19f   :  { %1659 = vmatprep.subr.bf16.mxu1 %v1645_v53 }
 0x1a1   :  { %1556 = vmatmul.mubr.msk.f32.gmra.mrb[12].mxu1 %vm533_vm3, %v63_v4 }
 0x1a2   :  { %1667 = vmatpush3.bf16.msra.mxu1 %v1645_v53  ;;  %1558 = vmatprep.mubr.msk.f32.mxu1 %vm533_vm3, %v64_v5 }
 0x1a3   :  { %1660 = vmatprep.subr.bf16.mxu1 %v1649_v62 }
 0x1a5   :  { %1559 = vmatmul.mubr.msk.f32.gmra.mrb[14].mxu1 %vm533_vm3, %v65_v8 }
 0x1a6   :  { %1668 = vmatpush3.bf16.msra.mxu1 %v1649_v62 }
 0x200   :  { %v367_v9 = vpop.xlane.xlu1 %366 }
 0x201   :  { %v397_v10 = vmul.f32 0.03125, %v367_v9 }
 0x203   :  { %v413_v45 = vadd.f32 1e-05, %v397_v10 }
 0x204   :  { %v365_v11 = vpop.xlane.xlu0 %364 }
 0x205   :  { %1688 = vrsqrt.f32 %v413_v45  ;;  %v396_v13 = vmul.f32 0.03125, %v365_v11 }
 0x207   :  { %v412_v14 = vadd.f32 1e-05, %v396_v13 }
 0x208   :  { %v371_v17 = vpop.xlane.xlu0 %370 }
 0x209   :  { %1690 = vrsqrt.f32 %v412_v14  ;;  %v399_v19 = vmul.f32 0.03125, %v371_v17 }
 0x20b   :  { %v415_v46 = vadd.f32 1e-05, %v399_v19 }
 0x20c   :  { %v379_v20 = vpop.xlane.xlu1 %378  ;;  %v369_v21 = vpop.xlane.xlu0 %368 }
 0x20d   :  { %1692 = vrsqrt.f32 %v415_v46  ;;  %v403_v22 = vmul.f32 0.03125, %v379_v20  ;;  %v398_v49 = vmul.f32 0.03125, %v369_v21 }
 0x20f   :  { %v1689_v23 = vpop.eup %1688  ;;  %v419_v26 = vadd.f32 1e-05, %v403_v22  ;;  %v414_v28 = vadd.f32 1e-05, %v398_v49 }
 0x210   :  { %v445_v54 = vmul.f32 %v1689_v23, %v1916_v59  ;;  %v377_v29 = vpop.xlane.xlu1 %376  ;;  %v375_v30 = vpop.xlane.xlu0 %374  ;;  %v2168_v59 = vld [vmem:[%s2470_s5 + $0x2] ss:$0 sm:$0xff] }
 0x211   :  { %1694 = vrsqrt.f32 %v419_v26  ;;  %v402_v32 = vmul.f32 0.03125, %v377_v29  ;;  %v401_v33 = vmul.f32 0.03125, %v375_v30 }
 0x212   :  { %1696 = vrsqrt.f32 %v414_v28  ;;  %v465_v39 = vmul.f32 %v2162_v50, %v445_v54 }
 0x213   :  { %v1691_v34 = vpop.eup %1690  ;;  %v418_v35 = vadd.f32 1e-05, %v402_v32  ;;  %v417_v36 = vadd.f32 1e-05, %v401_v33 }
 0x214   :  { %v381_v31 = vpop.xlane.xlu1 %380  ;;  %v373_v43 = vpop.xlane.xlu0 %372  ;;  %v444_v44 = vmul.f32 %v1691_v34, %v1921_v1  ;;  %v485_v48 = vadd.f32 %v2168_v59, %v465_v39 }
 0x215   :  { %1698 = vrsqrt.f32 %v418_v35  ;;  %v404_v51 = vmul.f32 0.03125, %v381_v31  ;;  %v400_v38 = vmul.f32 0.03125, %v373_v43 }
 0x216   :  { %1700 = vrsqrt.f32 %v417_v36  ;;  %v464_v52 = vmul.f32 %v2162_v50, %v444_v44  ;;  %v501_v8 = vmax.f32 %v485_v48, 0.0 }
 0x217   :  { %v1693_v53 = vpop.eup %1692  ;;  %v420_v56 = vadd.f32 1e-05, %v404_v51  ;;  %v416_v58 = vadd.f32 1e-05, %v400_v38 }
 0x218   :  { %v383_v60 = vpop.xlane.xlu1 %382  ;;  %v385_v41 = vpop.xlane.xlu0 %384  ;;  %v484_v62 = vadd.f32 %v2168_v59, %v464_v52  ;;  %v447_v63 = vmul.f32 %v1693_v53, %v1931_v7 }
 0x219   :  { %1702 = vrsqrt.f32 %v420_v56  ;;  %v405_v0 = vmul.f32 0.03125, %v383_v60  ;;  %v406_v1 = vmul.f32 0.03125, %v385_v41 }
 0x21a   :  { %1704 = vrsqrt.f32 %v416_v58  ;;  %v500_v42 = vmax.f32 %v484_v62, 0.0  ;;  %v467_v13 = vmul.f32 %v2162_v50, %v447_v63 }
 0x21b   :  { %v1695_v3 = vpop.eup %1694  ;;  %v421_v4 = vadd.f32 1e-05, %v405_v0  ;;  %v422_v5 = vadd.f32 1e-05, %v406_v1 }
 0x21c   :  { %v1697_v9 = vpop.eup %1696  ;;  %v451_v10 = vmul.f32 %v1695_v3, %v1940_v15  ;;  %v387_v45 = vpop.xlane.xlu1 %386  ;;  %1593 = vmatprep.mubr.f32.mxu0 %v500_v42  ;;  %v487_v26 = vadd.f32 %v2168_v59, %v467_v13 }
 0x21d   :  { %v389_v11 = vpop.xlane.xlu0 %388  ;;  %1706 = vrsqrt.f32 %v421_v4  ;;  %v407_v14 = vmul.f32 0.03125, %v387_v45  ;;  %1594 = vmatmul.mubr.f32.vlgmr.msra.gmra.mrb[16].mxu0 %v501_v8  ;;  %v446_v17 = vmul.f32 %v1697_v9, %v1928_v6 }
 0x21e   :  { %v408_v7 = vmul.f32 0.03125, %v389_v11  ;;  %1708 = vrsqrt.f32 %v422_v5  ;;  %v471_v22 = vmul.f32 %v2162_v50, %v451_v10  ;;  %v503_v44 = vmax.f32 %v487_v26, 0.0 }
 0x21f   :  { %v1699_v19 = vpop.eup %1698  ;;  %v423_v46 = vadd.f32 1e-05, %v407_v14  ;;  %v466_v21 = vmul.f32 %v2162_v50, %v446_v17 }
 0x220   :  { %v424_v20 = vadd.f32 1e-05, %v408_v7  ;;  %v1701_v15 = vpop.eup %1700  ;;  %v391_v49 = vpop.xlane.xlu1 %390  ;;  %v450_v28 = vmul.f32 %v1699_v19, %v1952_v24  ;;  %v491_v39 = vadd.f32 %v2168_v59, %v471_v22 }
 0x221   :  { %v393_v23 = vpop.xlane.xlu0 %392  ;;  %1710 = vrsqrt.f32 %v423_v46  ;;  %v409_v54 = vmul.f32 0.03125, %v391_v49  ;;  %v486_v6 = vadd.f32 %v2168_v59, %v466_v21  ;;  %v449_v32 = vmul.f32 %v1701_v15, %v1943_v16 }
 0x222   :  { %v410_v29 = vmul.f32 0.03125, %v393_v23  ;;  %1712 = vrsqrt.f32 %v424_v20  ;;  %v470_v30 = vmul.f32 %v2162_v50, %v450_v28  ;;  %v507_v60 = vmax.f32 %v491_v39, 0.0 }
 0x223   :  { %v1703_v33 = vpop.eup %1702  ;;  %v425_v34 = vadd.f32 1e-05, %v409_v54  ;;  %v502_v36 = vmax.f32 %v486_v6, 0.0  ;;  %v469_v38 = vmul.f32 %v2162_v50, %v449_v32 }
 0x224   :  { %v426_v35 = vadd.f32 1e-05, %v410_v29  ;;  %v1705_v31 = vpop.eup %1704  ;;  %v395_v43 = vpop.xlane.xlu1 %394  ;;  %v490_v24 = vadd.f32 %v2168_v59, %v470_v30  ;;  %v452_v51 = vmul.f32 %v1703_v33, %v1975_v37 }
 0x225   :  { %1714 = vrsqrt.f32 %v425_v34  ;;  %v411_v52 = vmul.f32 0.03125, %v395_v43  ;;  %1596 = vmatprep.mubr.f32.mxu0 %v502_v36  ;;  %v448_v16 = vmul.f32 %v1705_v31, %v1955_v25  ;;  %v489_v63 = vadd.f32 %v2168_v59, %v469_v38  ;;  %v1436_v43 = vld [vmem:[%s2470_s5 + $0x3] ss:$0 sm:$0xff] }
 0x226   :  { %1716 = vrsqrt.f32 %v426_v35  ;;  %1597 = vmatmul.mubr.f32.gmra.mrb[18].mxu0 %v503_v44  ;;  %v506_v53 = vmax.f32 %v490_v24, 0.0  ;;  %v472_v56 = vmul.f32 %v2162_v50, %v452_v51 }
 0x227   :  { %v1707_v58 = vpop.eup %1706  ;;  %v427_v48 = vadd.f32 1e-05, %v411_v52  ;;  %v468_v41 = vmul.f32 %v2162_v50, %v448_v16  ;;  %v505_v10 = vmax.f32 %v489_v63, 0.0 }
 0x228   :  { %v1709_v62 = vpop.eup %1708  ;;  %1602 = vmatprep.mubr.f32.mxu1 %v506_v53  ;;  %v492_v37 = vadd.f32 %v2168_v59, %v472_v56  ;;  %v453_v0 = vmul.f32 %v1707_v58, %v1999_v61 }
 0x229   :  { %1718 = vrsqrt.f32 %v427_v48  ;;  %1603 = vmatmul.mubr.f32.vlgmr.msra.gmra.mrb[6].mxu1 %v507_v60  ;;  %v488_v25 = vadd.f32 %v2168_v59, %v468_v41  ;;  %v454_v1 = vmul.f32 %v1709_v62, %v1989_v47 }
 0x22a   :  { %v508_v42 = vmax.f32 %v492_v37, 0.0  ;;  %v473_v3 = vmul.f32 %v2162_v50, %v453_v0 }
 0x22b   :  { %v1711_v4 = vpop.eup %1710  ;;  %v504_v5 = vmax.f32 %v488_v25, 0.0  ;;  %v474_v8 = vmul.f32 %v2162_v50, %v454_v1 }
 0x22c   :  { %v1713_v9 = vpop.eup %1712  ;;  %1605 = vmatprep.mubr.f32.mxu1 %v508_v42  ;;  %v493_v45 = vadd.f32 %v2168_v59, %v473_v3  ;;  %v455_v61 = vmul.f32 %v1711_v4, %v2033_v12 }
 0x22d   :  { %1599 = vmatprep.mubr.f32.mxu0 %v504_v5  ;;  %v494_v11 = vadd.f32 %v2168_v59, %v474_v8  ;;  %v456_v13 = vmul.f32 %v1713_v9, %v2016_v2 }
 0x22e   :  { %1600 = vmatmul.mubr.f32.gmra.mrb[20].mxu0 %v505_v10  ;;  %v509_v47 = vmax.f32 %v493_v45, 0.0  ;;  %v475_v14 = vmul.f32 %v2162_v50, %v455_v61 }
 0x22f   :  { %v1715_v7 = vpop.eup %1714  ;;  %v510_v17 = vmax.f32 %v494_v11, 0.0  ;;  %v476_v19 = vmul.f32 %v2162_v50, %v456_v13 }
 0x230   :  { %v1717_v46 = vpop.eup %1716  ;;  %1606 = vmatmul.mubr.f32.gmra.mrb[8].mxu1 %v509_v47  ;;  %v495_v20 = vadd.f32 %v2168_v59, %v475_v14  ;;  %v457_v21 = vmul.f32 %v1715_v7, %v2065_v27 }
 0x231   :  { %1608 = vmatprep.mubr.f32.mxu1 %v510_v17  ;;  %v496_v12 = vadd.f32 %v2168_v59, %v476_v19  ;;  %v458_v22 = vmul.f32 %v1717_v46, %v2044_v18 }
 0x232   :  { %v511_v2 = vmax.f32 %v495_v20, 0.0  ;;  %v477_v15 = vmul.f32 %v2162_v50, %v457_v21 }
 0x233   :  { %v1719_v49 = vpop.eup %1718  ;;  %v512_v23 = vmax.f32 %v496_v12, 0.0  ;;  %v478_v26 = vmul.f32 %v2162_v50, %v458_v22 }
 0x234   :  { %1609 = vmatmul.mubr.f32.gmra.mrb[10].mxu1 %v511_v2  ;;  %v497_v28 = vadd.f32 %v2168_v59, %v477_v15  ;;  %v459_v54 = vmul.f32 %v1719_v49, %v2092_v40 }
 0x235   :  { %1611 = vmatprep.mubr.f32.mxu1 %v512_v23  ;;  %v498_v27 = vadd.f32 %v2168_v59, %v478_v26 }
 0x236   :  { %v513_v29 = vmax.f32 %v497_v28, 0.0  ;;  %v479_v6 = vmul.f32 %v2162_v50, %v459_v54 }
 0x237   :  { %v514_v30 = vmax.f32 %v498_v27, 0.0 }
 0x238   :  { %1612 = vmatmul.mubr.f32.gmra.mrb[12].mxu1 %v513_v29  ;;  %v499_v18 = vadd.f32 %v2168_v59, %v479_v6 }
 0x239   :  { %1614 = vmatprep.mubr.f32.mxu1 %v514_v30 }
 0x23a   :  { %v515_v32 = vmax.f32 %v499_v18, 0.0 }
 0x23c   :  { %1615 = vmatmul.mubr.f32.gmra.mrb[14].mxu1 %v515_v32 }
 0x25b   :  { %v1539_v33 = vpop.f32.mrb[0].mxu1 }
 0x25c   :  { %v652_v34 = vpop.f32.mrb[1].mxu1 }
 0x260   :  { %v1542_v35 = vpop.f32.mrb[2].mxu1 }
 0x261   :  { %v662_v36 = vpop.f32.mrb[3].mxu1 }
 0x264   :  { %v1545_v39 = vpop.f32.mrb[4].mxu1 }
 0x265   :  { %v672_v31 = vpop.f32.mrb[5].mxu1 }
 0x2f0   :  { %v1595_v40 = vpop.f32.mrb[16].mxu0 }
 0x2f1   :  { %v803_v44 = vadd.f32 %v1595_v40, %v1539_v33  ;;  %v797_v50 = vpop.f32.mrb[17].mxu0 }
 0x2f2   :  { %v798_v24 = vadd.f32 %v797_v50, %v652_v34 }
 0x2f3   :  { %v881_v51 = vadd.f32 %v1436_v43, %v803_v44 }
 0x2f4   :  { %v880_v38 = vadd.f32 %v1436_v43, %v798_v24 }
 0x2f5   :  { %898 = vadd.xlane.f32.xlu1 %v881_v51 }
 0x2f6   :  { %896 = vadd.xlane.f32.xlu0 %v880_v38 }
 0x2f9   :  { %v1598_v59 = vpop.f32.mrb[18].mxu0 }
 0x2fa   :  { %v813_v52 = vadd.f32 %v1598_v59, %v1542_v35  ;;  %v807_v16 = vpop.f32.mrb[19].mxu0 }
 0x2fb   :  { %v808_v53 = vadd.f32 %v807_v16, %v662_v36 }
 0x2fc   :  { %v1604_v56 = vpop.f32.mrb[6].mxu1  ;;  %v883_v58 = vadd.f32 %v1436_v43, %v813_v52 }
 0x2fd   :  { %v827_v48 = vpop.f32.mrb[7].mxu1  ;;  %v882_v60 = vadd.f32 %v1436_v43, %v808_v53  ;;  %v887_v4 = vadd.f32 %v1604_v56, %v1436_v43 }
 0x2fe   :  { %902 = vadd.xlane.f32.xlu1 %v883_v58  ;;  %v886_v8 = vadd.f32 %v1436_v43, %v827_v48 }
 0x2ff   :  { %900 = vadd.xlane.f32.xlu0 %v882_v60 }
 0x301   :  { %v1601_v41 = vpop.f32.mrb[20].mxu0 }
 0x302   :  { %v823_v62 = vadd.f32 %v1601_v41, %v1545_v39  ;;  %v817_v37 = vpop.f32.mrb[21].mxu0 }
 0x303   :  { %v818_v63 = vadd.f32 %v817_v37, %v672_v31  ;;  %v1607_v0 = vpop.f32.mrb[8].mxu1 }
 0x304   :  { %v837_v25 = vpop.f32.mrb[9].mxu1  ;;  %v885_v1 = vadd.f32 %v1436_v43, %v823_v62  ;;  %v2219_v10 = vadd.f32 %v1607_v0, %v1436_v43 }
 0x305   :  { %v884_v42 = vadd.f32 %v1436_v43, %v818_v63  ;;  %v2221_v61 = vadd.f32 %v1436_v43, %v837_v25 }
 0x306   :  { %906 = vadd.xlane.f32.xlu1 %v885_v1 }
 0x307   :  { %904 = vadd.xlane.f32.xlu0 %v884_v42  ;;  %v1610_v3 = vpop.f32.mrb[10].mxu1 }
 0x308   :  { %v847_v5 = vpop.f32.mrb[11].mxu1  ;;  %v2225_v13 = vadd.f32 %v1610_v3, %v1436_v43 }
 0x309   :  { %v2227_v14 = vadd.f32 %v1436_v43, %v847_v5 }
 0x30a   :  { %910 = vadd.xlane.f32.xlu1 %v887_v4 }
 0x30b   :  { %908 = vadd.xlane.f32.xlu0 %v886_v8  ;;  %v1613_v9 = vpop.f32.mrb[12].mxu1 }
 0x30c   :  { %v857_v45 = vpop.f32.mrb[13].mxu1  ;;  %v2231_v7 = vadd.f32 %v1613_v9, %v1436_v43 }
 0x30d   :  { %v2233_v17 = vadd.f32 %v1436_v43, %v857_v45 }
 0x30e   :  { %914 = vadd.xlane.f32.xlu1 %v2219_v10 }
 0x30f   :  { %912 = vadd.xlane.f32.xlu0 %v2221_v61  ;;  %v1616_v11 = vpop.f32.mrb[14].mxu1 }
 0x310   :  { %v867_v47 = vpop.f32.mrb[15].mxu1  ;;  %v2237_v19 = vadd.f32 %v1616_v11, %v1436_v43 }
 0x311   :  { %v2239_v46 = vadd.f32 %v1436_v43, %v867_v47 }
 0x312   :  { %918 = vadd.xlane.f32.xlu1 %v2225_v13 }
 0x313   :  { %916 = vadd.xlane.f32.xlu0 %v2227_v14 }
 0x316   :  { %922 = vadd.xlane.f32.xlu1 %v2231_v7 }
 0x317   :  { %920 = vadd.xlane.f32.xlu0 %v2233_v17 }
 0x31a   :  { %926 = vadd.xlane.f32.xlu1 %v2237_v19 }
 0x31b   :  { %924 = vadd.xlane.f32.xlu0 %v2239_v46 }
 0x382   :  { %v899_v20 = vpop.xlane.xlu1 %898 }
 0x383   :  { %v929_v21 = vmul.f32 0.03125, %v899_v20  ;;  %v897_v12 = vpop.xlane.xlu0 %896 }
 0x384   :  { %v928_v22 = vmul.f32 0.03125, %v897_v12 }
 0x385   :  { %v2243_v2 = vsub.f32 %v881_v51, %v929_v21 }
 0x386   :  { %v2245_v15 = vsub.f32 %v880_v38, %v928_v22 }
 0x387   :  { %v961_v49 = vmul.f32 %v2243_v2, %v2243_v2 }
 0x388   :  { %v960_v23 = vmul.f32 %v2245_v15, %v2245_v15 }
 0x389   :  { %v977_v26 = vsel %vm33_vm1, %v961_v49, 0.0 }
 0x38a   :  { %994 = vadd.xlane.f32.xlu1 %v977_v26  ;;  %v976_v28 = vsel %vm33_vm1, %v960_v23, 0.0 }
 0x38b   :  { %v903_v54 = vpop.xlane.xlu1 %902  ;;  %992 = vadd.xlane.f32.xlu0 %v976_v28 }
 0x38c   :  { %v931_v27 = vmul.f32 0.03125, %v903_v54  ;;  %v901_v29 = vpop.xlane.xlu0 %900 }
 0x38d   :  { %v930_v6 = vmul.f32 0.03125, %v901_v29 }
 0x38e   :  { %v2255_v30 = vsub.f32 %v883_v58, %v931_v27 }
 0x38f   :  { %v2257_v18 = vsub.f32 %v882_v60, %v930_v6 }
 0x390   :  { %v963_v32 = vmul.f32 %v2255_v30, %v2255_v30 }
 0x391   :  { %v962_v33 = vmul.f32 %v2257_v18, %v2257_v18 }
 0x392   :  { %v979_v34 = vsel %vm33_vm1, %v963_v32, 0.0 }
 0x393   :  { %v907_v35 = vpop.xlane.xlu1 %906  ;;  %998 = vadd.xlane.f32.xlu1 %v979_v34  ;;  %v978_v36 = vsel %vm33_vm1, %v962_v33, 0.0 }
 0x394   :  { %v933_v39 = vmul.f32 0.03125, %v907_v35  ;;  %996 = vadd.xlane.f32.xlu0 %v978_v36  ;;  %v905_v31 = vpop.xlane.xlu0 %904 }
 0x395   :  { %v932_v40 = vmul.f32 0.03125, %v905_v31 }
 0x396   :  { %v2267_v43 = vsub.f32 %v885_v1, %v933_v39 }
 0x397   :  { %v2269_v44 = vsub.f32 %v884_v42, %v932_v40  ;;  %v911_v50 = vpop.xlane.xlu1 %910 }
 0x398   :  { %v935_v24 = vmul.f32 0.03125, %v911_v50  ;;  %v909_v51 = vpop.xlane.xlu0 %908  ;;  %v965_v38 = vmul.f32 %v2267_v43, %v2267_v43 }
 0x399   :  { %v934_v59 = vmul.f32 0.03125, %v909_v51  ;;  %v964_v52 = vmul.f32 %v2269_v44, %v2269_v44 }
 0x39a   :  { %v2275_v16 = vsub.f32 %v887_v4, %v935_v24  ;;  %v981_v53 = vsel %vm33_vm1, %v965_v38, 0.0 }
 0x39b   :  { %v2279_v56 = vsub.f32 %v886_v8, %v934_v59  ;;  %v915_v58 = vpop.xlane.xlu1 %914  ;;  %1002 = vadd.xlane.f32.xlu1 %v981_v53  ;;  %v980_v48 = vsel %vm33_vm1, %v964_v52, 0.0 }
 0x39c   :  { %v937_v60 = vmul.f32 0.03125, %v915_v58  ;;  %1000 = vadd.xlane.f32.xlu0 %v980_v48  ;;  %v913_v41 = vpop.xlane.xlu0 %912  ;;  %v967_v62 = vmul.f32 %v2275_v16, %v2275_v16 }
 0x39d   :  { %v936_v37 = vmul.f32 0.03125, %v913_v41  ;;  %v966_v63 = vmul.f32 %v2279_v56, %v2279_v56 }
 0x39e   :  { %v2288_v0 = vsub.f32 %v2219_v10, %v937_v60  ;;  %v983_v25 = vsel %vm33_vm1, %v967_v62, 0.0 }
 0x39f   :  { %v2293_v1 = vsub.f32 %v2221_v61, %v936_v37  ;;  %v919_v42 = vpop.xlane.xlu1 %918  ;;  %1006 = vadd.xlane.f32.xlu1 %v983_v25  ;;  %v982_v3 = vsel %vm33_vm1, %v966_v63, 0.0  ;;  %v2350_v37 = vld [vmem:[%s2470_s5 + $0x4] ss:$0 sm:$0xff] }
 0x3a0   :  { %v939_v4 = vmul.f32 0.03125, %v919_v42  ;;  %1004 = vadd.xlane.f32.xlu0 %v982_v3  ;;  %v917_v5 = vpop.xlane.xlu0 %916  ;;  %v969_v8 = vmul.f32 %v2288_v0, %v2288_v0  ;;  %v2356_v3 = vld [vmem:[%s2470_s5 + $0x5] ss:$0 sm:$0xff] }
 0x3a1   :  { %v938_v9 = vmul.f32 0.03125, %v917_v5  ;;  %v968_v10 = vmul.f32 %v2293_v1, %v2293_v1 }
 0x3a2   :  { %v2302_v45 = vsub.f32 %v2225_v13, %v939_v4  ;;  %v985_v61 = vsel %vm33_vm1, %v969_v8, 0.0 }
 0x3a3   :  { %v2307_v11 = vsub.f32 %v2227_v14, %v938_v9  ;;  %v923_v47 = vpop.xlane.xlu1 %922  ;;  %1010 = vadd.xlane.f32.xlu1 %v985_v61  ;;  %v984_v20 = vsel %vm33_vm1, %v968_v10, 0.0 }
 0x3a4   :  { %v941_v21 = vmul.f32 0.03125, %v923_v47  ;;  %1008 = vadd.xlane.f32.xlu0 %v984_v20  ;;  %v921_v12 = vpop.xlane.xlu0 %920  ;;  %v971_v22 = vmul.f32 %v2302_v45, %v2302_v45 }
 0x3a5   :  { %v940_v49 = vmul.f32 0.03125, %v921_v12  ;;  %v970_v13 = vmul.f32 %v2307_v11, %v2307_v11  ;;  %v2365_v12 = vld [vmem:[%s2470_s5 + $0x6] ss:$0 sm:$0xff] }
 0x3a6   :  { %v2316_v23 = vsub.f32 %v2231_v7, %v941_v21  ;;  %v987_v14 = vsel %vm33_vm1, %v971_v22, 0.0 }
 0x3a7   :  { %v2321_v26 = vsub.f32 %v2233_v17, %v940_v49  ;;  %1014 = vadd.xlane.f32.xlu1 %v987_v14  ;;  %v927_v28 = vpop.xlane.xlu1 %926  ;;  %v986_v54 = vsel %vm33_vm1, %v970_v13, 0.0 }
 0x3a8   :  { %v943_v27 = vmul.f32 0.03125, %v927_v28  ;;  %1012 = vadd.xlane.f32.xlu0 %v986_v54  ;;  %v925_v29 = vpop.xlane.xlu0 %924  ;;  %v973_v6 = vmul.f32 %v2316_v23, %v2316_v23 }
 0x3a9   :  { %v942_v32 = vmul.f32 0.03125, %v925_v29  ;;  %v972_v7 = vmul.f32 %v2321_v26, %v2321_v26 }
 0x3aa   :  { %v2330_v33 = vsub.f32 %v2237_v19, %v943_v27  ;;  %v989_v17 = vsel %vm33_vm1, %v973_v6, 0.0 }
 0x3ab   :  { %v2335_v34 = vsub.f32 %v2239_v46, %v942_v32  ;;  %1018 = vadd.xlane.f32.xlu1 %v989_v17  ;;  %v988_v35 = vsel %vm33_vm1, %v972_v7, 0.0  ;;  %v1752_v46 = vmov 0  }
 0x3ac   :  { %1016 = vadd.xlane.f32.xlu0 %v988_v35  ;;  %v975_v36 = vmul.f32 %v2330_v33, %v2330_v33  ;;  %1686 = vset.pattern.permute.xlu1 %v1752_v46 }
 0x3ad   :  { %v974_v39 = vmul.f32 %v2335_v34, %v2335_v34  ;;  %1687 = vset.pattern.permute.xlu0 %v1752_v46 }
 0x3ae   :  { %v991_v19 = vsel %vm33_vm1, %v975_v36, 0.0 }
 0x3af   :  { %1022 = vadd.xlane.f32.xlu1 %v991_v19  ;;  %v990_v31 = vsel %vm33_vm1, %v974_v39, 0.0  ;;  %vm1385_vm1 = vcmask 982912  }
 0x3b0   :  { %1020 = vadd.xlane.f32.xlu0 %v990_v31 }
 0x417   :  { %v995_v40 = vpop.xlane.xlu1 %994 }
 0x418   :  { %v1025_v50 = vmul.f32 0.03125, %v995_v40  ;;  %v993_v24 = vpop.xlane.xlu0 %992 }
 0x419   :  { %v1024_v51 = vmul.f32 0.03125, %v993_v24 }
 0x41a   :  { %v1041_v38 = vadd.f32 1e-05, %v1025_v50 }
 0x41b   :  { %v1040_v59 = vadd.f32 1e-05, %v1024_v51 }
 0x41c   :  { %1720 = vrsqrt.f32 %v1041_v38 }
 0x41d   :  { %1722 = vrsqrt.f32 %v1040_v59 }
 0x420   :  { %v999_v52 = vpop.xlane.xlu1 %998 }
 0x421   :  { %v1027_v53 = vmul.f32 0.03125, %v999_v52  ;;  %v997_v58 = vpop.xlane.xlu0 %996 }
 0x422   :  { %v1026_v48 = vmul.f32 0.03125, %v997_v58 }
 0x423   :  { %v1043_v60 = vadd.f32 1e-05, %v1027_v53 }
 0x424   :  { %v1042_v41 = vadd.f32 1e-05, %v1026_v48 }
 0x425   :  { %1724 = vrsqrt.f32 %v1043_v60 }
 0x426   :  { %v1721_v62 = vpop.eup %1720  ;;  %1726 = vrsqrt.f32 %v1042_v41 }
 0x427   :  { %v1723_v63 = vpop.eup %1722  ;;  %v1073_v25 = vmul.f32 %v1721_v62, %v2243_v2 }
 0x428   :  { %v1003_v42 = vpop.xlane.xlu1 %1002  ;;  %v1072_v4 = vmul.f32 %v1723_v63, %v2245_v15 }
 0x429   :  { %v1029_v5 = vmul.f32 0.03125, %v1003_v42  ;;  %v1001_v8 = vpop.xlane.xlu0 %1000  ;;  %v1093_v9 = vmul.f32 %v2350_v37, %v1073_v25 }
 0x42a   :  { %v1028_v10 = vmul.f32 0.03125, %v1001_v8  ;;  %v1092_v61 = vmul.f32 %v2350_v37, %v1072_v4 }
 0x42b   :  { %v1045_v47 = vadd.f32 1e-05, %v1029_v5  ;;  %v1113_v20 = vadd.f32 %v2356_v3, %v1093_v9 }
 0x42c   :  { %v1044_v21 = vadd.f32 1e-05, %v1028_v10  ;;  %v1007_v2 = vpop.xlane.xlu1 %1006  ;;  %v1112_v22 = vadd.f32 %v2356_v3, %v1092_v61 }
 0x42d   :  { %1728 = vrsqrt.f32 %v1045_v47  ;;  %v1031_v15 = vmul.f32 0.03125, %v1007_v2  ;;  %v1005_v49 = vpop.xlane.xlu0 %1004  ;;  %v1129_v13 = vmax.f32 %v1113_v20, 0.0 }
 0x42e   :  { %1730 = vrsqrt.f32 %v1044_v21  ;;  %v1030_v14 = vmul.f32 0.03125, %v1005_v49  ;;  %v1128_v28 = vmax.f32 %v1112_v22, 0.0 }
 0x42f   :  { %v1725_v54 = vpop.eup %1724  ;;  %v1047_v27 = vadd.f32 1e-05, %v1031_v15  ;;  %v1149_v29 = vmul.f32 %v2365_v12, %v1129_v13 }
 0x430   :  { %v1727_v6 = vpop.eup %1726  ;;  %v1046_v32 = vadd.f32 1e-05, %v1030_v14  ;;  %v1011_v7 = vpop.xlane.xlu1 %1010  ;;  %v1148_v17 = vmul.f32 %v2365_v12, %v1128_v28  ;;  %v1075_v35 = vmul.f32 %v1725_v54, %v2255_v30 }
 0x431   :  { %1732 = vrsqrt.f32 %v1047_v27  ;;  %v1033_v36 = vmul.f32 0.03125, %v1011_v7  ;;  %v1009_v39 = vpop.xlane.xlu0 %1008  ;;  %1166 = vadd.xlane.f32.xlu1 %v1149_v29  ;;  %v1074_v19 = vmul.f32 %v1727_v6, %v2257_v18 }
 0x432   :  { %1734 = vrsqrt.f32 %v1046_v32  ;;  %v1032_v31 = vmul.f32 0.03125, %v1009_v39  ;;  %1164 = vadd.xlane.f32.xlu0 %v1148_v17  ;;  %v1095_v46 = vmul.f32 %v2350_v37, %v1075_v35 }
 0x433   :  { %v1049_v40 = vadd.f32 1e-05, %v1033_v36  ;;  %v1094_v50 = vmul.f32 %v2350_v37, %v1074_v19 }
 0x434   :  { %v1048_v24 = vadd.f32 1e-05, %v1032_v31  ;;  %v1015_v51 = vpop.xlane.xlu1 %1014  ;;  %v1115_v38 = vadd.f32 %v2356_v3, %v1095_v46 }
 0x435   :  { %1736 = vrsqrt.f32 %v1049_v40  ;;  %v1035_v30 = vmul.f32 0.03125, %v1015_v51  ;;  %v1013_v59 = vpop.xlane.xlu0 %1012  ;;  %v1114_v52 = vadd.f32 %v2356_v3, %v1094_v50 }
 0x436   :  { %1738 = vrsqrt.f32 %v1048_v24  ;;  %v1034_v53 = vmul.f32 0.03125, %v1013_v59  ;;  %v1131_v18 = vmax.f32 %v1115_v38, 0.0 }
 0x437   :  { %v1729_v58 = vpop.eup %1728  ;;  %v1051_v48 = vadd.f32 1e-05, %v1035_v30  ;;  %v1130_v60 = vmax.f32 %v1114_v52, 0.0 }
 0x438   :  { %v1731_v41 = vpop.eup %1730  ;;  %v1050_v62 = vadd.f32 1e-05, %v1034_v53  ;;  %v1019_v63 = vpop.xlane.xlu1 %1018  ;;  %v1151_v25 = vmul.f32 %v2365_v12, %v1131_v18  ;;  %v1077_v42 = vmul.f32 %v1729_v58, %v2267_v43 }
 0x439   :  { %1740 = vrsqrt.f32 %v1051_v48  ;;  %v1037_v4 = vmul.f32 0.03125, %v1019_v63  ;;  %v1017_v5 = vpop.xlane.xlu0 %1016  ;;  %v1150_v8 = vmul.f32 %v2365_v12, %v1130_v60  ;;  %v1076_v9 = vmul.f32 %v1731_v41, %v2269_v44 }
 0x43a   :  { %1742 = vrsqrt.f32 %v1050_v62  ;;  %v1036_v10 = vmul.f32 0.03125, %v1017_v5  ;;  %1170 = vadd.xlane.f32.xlu1 %v1151_v25  ;;  %v1097_v61 = vmul.f32 %v2350_v37, %v1077_v42 }
 0x43b   :  { %v1733_v47 = vpop.eup %1732  ;;  %v1053_v20 = vadd.f32 1e-05, %v1037_v4  ;;  %1168 = vadd.xlane.f32.xlu0 %v1150_v8  ;;  %v1096_v21 = vmul.f32 %v2350_v37, %v1076_v9 }
 0x43c   :  { %v1735_v2 = vpop.eup %1734  ;;  %v1052_v22 = vadd.f32 1e-05, %v1036_v10  ;;  %v1023_v43 = vpop.xlane.xlu1 %1022  ;;  %v1117_v15 = vadd.f32 %v2356_v3, %v1097_v61  ;;  %v1079_v49 = vmul.f32 %v1733_v47, %v2275_v16  ;;  %v30_v61 = vld [vmem:[%s2470_s5 + $0x7] sm:$0x1] }
 0x43d   :  { %1744 = vrsqrt.f32 %v1053_v20  ;;  %v1021_v13 = vpop.xlane.xlu0 %1020  ;;  %v1116_v44 = vadd.f32 %v2356_v3, %v1096_v21  ;;  %v1078_v14 = vmul.f32 %v1735_v2, %v2279_v56  ;;  %v1039_v6 = vmul.f32 0.03125, %v1023_v43 }
 0x43e   :  { %v1038_v28 = vmul.f32 0.03125, %v1021_v13  ;;  %v1133_v54 = vmax.f32 %v1117_v15, 0.0  ;;  %v1099_v27 = vmul.f32 %v2350_v37, %v1079_v49  ;;  %1746 = vrsqrt.f32 %v1052_v22 }
 0x43f   :  { %v1737_v29 = vpop.eup %1736  ;;  %v1132_v32 = vmax.f32 %v1116_v44, 0.0  ;;  %v1098_v7 = vmul.f32 %v2350_v37, %v1078_v14  ;;  %v1055_v24 = vadd.f32 1e-05, %v1039_v6 }
 0x440   :  { %v1739_v17 = vpop.eup %1738  ;;  %v1054_v35 = vadd.f32 1e-05, %v1038_v28  ;;  %v1153_v16 = vmul.f32 %v2365_v12, %v1133_v54  ;;  %v1119_v36 = vadd.f32 %v2356_v3, %v1099_v27  ;;  %v1081_v39 = vmul.f32 %v1737_v29, %v2288_v0 }
 0x441   :  { %v1152_v56 = vmul.f32 %v2365_v12, %v1132_v32  ;;  %v1118_v19 = vadd.f32 %v2356_v3, %v1098_v7  ;;  %v1080_v31 = vmul.f32 %v1739_v17, %v2293_v1 }
 0x442   :  { %1174 = vadd.xlane.f32.xlu1 %v1153_v16  ;;  %v1135_v46 = vmax.f32 %v1119_v36, 0.0  ;;  %v1101_v40 = vmul.f32 %v2350_v37, %v1081_v39  ;;  %1748 = vrsqrt.f32 %v1054_v35 }
 0x443   :  { %v1741_v50 = vpop.eup %1740  ;;  %1172 = vadd.xlane.f32.xlu0 %v1152_v56  ;;  %v1100_v30 = vmul.f32 %v2350_v37, %v1080_v31  ;;  %v1134_v59 = vmax.f32 %v1118_v19, 0.0  ;;  %1750 = vrsqrt.f32 %v1055_v24 }
 0x444   :  { %v1743_v51 = vpop.eup %1742  ;;  %v1155_v38 = vmul.f32 %v2365_v12, %v1135_v46  ;;  %v1083_v0 = vmul.f32 %v1741_v50, %v2302_v45  ;;  %v1121_v52 = vadd.f32 %v2356_v3, %v1101_v40 }
 0x445   :  { %v1082_v1 = vmul.f32 %v1743_v51, %v2307_v11  ;;  %v1120_v58 = vadd.f32 %v2356_v3, %v1100_v30  ;;  %v1154_v41 = vmul.f32 %v2365_v12, %v1134_v59 }
 0x446   :  { %v1103_v53 = vmul.f32 %v2350_v37, %v1083_v0  ;;  %v1137_v62 = vmax.f32 %v1121_v52, 0.0 }
 0x447   :  { %v1745_v18 = vpop.eup %1744  ;;  %1178 = vadd.xlane.f32.xlu0 %v1155_v38  ;;  %v1102_v45 = vmul.f32 %v2350_v37, %v1082_v1  ;;  %v1136_v11 = vmax.f32 %v1120_v58, 0.0 }
 0x448   :  { %v1123_v48 = vadd.f32 %v2356_v3, %v1103_v53  ;;  %v1747_v60 = vpop.eup %1746  ;;  %v1085_v63 = vmul.f32 %v1745_v18, %v2316_v23  ;;  %v1157_v4 = vmul.f32 %v2365_v12, %v1137_v62 }
 0x449   :  { %v1122_v5 = vadd.f32 %v2356_v3, %v1102_v45  ;;  %v1084_v9 = vmul.f32 %v1747_v60, %v2321_v26  ;;  %v1156_v23 = vmul.f32 %v2365_v12, %v1136_v11 }
 0x44a   :  { %v1139_v25 = vmax.f32 %v1123_v48, 0.0  ;;  %v1105_v8 = vmul.f32 %v2350_v37, %v1085_v63 }
 0x44b   :  { %1176 = vadd.xlane.f32.xlu0 %v1154_v41  ;;  %v1138_v20 = vmax.f32 %v1122_v5, 0.0  ;;  %v1104_v2 = vmul.f32 %v2350_v37, %v1084_v9  ;;  %v1289_v9 = vadd.s32 4294967288, %v1914_v57 }
 0x44c   :  { %v1159_v42 = vmul.f32 %v2365_v12, %v1139_v25  ;;  %v1749_v10 = vpop.eup %1748  ;;  %v1125_v21 = vadd.f32 %v2356_v3, %v1105_v8 }
 0x44d   :  { %v1751_v47 = vpop.eup %1750  ;;  %v1086_v22 = vmul.f32 %v1749_v10, %v2335_v34  ;;  %v1158_v43 = vmul.f32 %v2365_v12, %v1138_v20  ;;  %v1124_v49 = vadd.f32 %v2356_v3, %v1104_v2  ;;  %v1296_v10 = vadd.s32 4294967280, %v1914_v57 }
 0x44e   :  { %v1087_v26 = vmul.f32 %v1751_v47, %v2330_v33  ;;  %v1141_v15 = vmax.f32 %v1125_v21, 0.0  ;;  %v1310_v2 = vadd.s32 4294967264, %v1914_v57 }
 0x44f   :  { %1182 = vadd.xlane.f32.xlu0 %v1157_v4  ;;  %v1106_v13 = vmul.f32 %v2350_v37, %v1086_v22  ;;  %v1140_v14 = vmax.f32 %v1124_v49, 0.0  ;;  %v1303_v22 = vadd.s32 4294967272, %v1914_v57 }
 0x450   :  { %v1161_v44 = vmul.f32 %v2365_v12, %v1141_v15  ;;  %v1107_v54 = vmul.f32 %v2350_v37, %v1087_v26  ;;  %v2430_v37 = vshrl.u32 %v31_v55, 7 }
 0x451   :  { %v1126_v28 = vadd.f32 %v2356_v3, %v1106_v13  ;;  %v1160_v34 = vmul.f32 %v2365_v12, %v1140_v14 }
 0x452   :  { %v1127_v33 = vadd.f32 %v2356_v3, %v1107_v54  ;;  %v1202_v3 = vsub.s32 0, %v2430_v37  ;;  %v1287_v47 = vsub.s32 %v1914_v57, %v2430_v37  ;;  %v1299_v21 = vsub.s32 %v1296_v10, %v2430_v37 }
 0x453   :  { %1198 = vperm.xlu1 %1686, %v30_v61   ;;  %1180 = vadd.xlane.f32.xlu0 %v1156_v23  ;;  %v1142_v27 = vmax.f32 %v1126_v28, 0.0  ;;  %v1292_v23 = vsub.s32 %v1289_v9, %v2430_v37  ;;  %v1313_v13 = vsub.s32 %v1310_v2, %v2430_v37  ;;  %v1306_v14 = vsub.s32 %v1303_v22, %v2430_v37 }
 0x454   :  { %v1143_v6 = vmax.f32 %v1127_v33, 0.0  ;;  %v1317_v28 = vadd.s32 4294967256, %v1914_v57 }
 0x455   :  { %v1162_v29 = vmul.f32 %v2365_v12, %v1142_v27 }
 0x456   :  { %v1163_v32 = vmul.f32 %v2365_v12, %v1143_v6  ;;  %v1338_v6 = vadd.s32 4294967232, %v1914_v57 }
 0x457   :  { %1184 = vadd.xlane.f32.xlu0 %v1158_v43 }
 0x45b   :  { %1190 = vadd.xlane.f32.xlu0 %v1161_v44  ;;  %v1324_v44 = vadd.s32 4294967248, %v1914_v57 }
 0x45f   :  { %1188 = vadd.xlane.f32.xlu0 %v1160_v34 }
 0x463   :  { %1192 = vadd.xlane.f32.xlu0 %v1162_v29  ;;  %v1327_v29 = vsub.s32 %v1324_v44, %v2430_v37 }
 0x467   :  { %1194 = vadd.xlane.f32.xlu0 %v1163_v32 }
 0x477   :  { %1186 = vadd.xlane.f32.xlu1 %v1159_v42 }
 0x4be   :  { %v1167_v7 = vpop.xlane.xlu1 %1166 }
 0x4bf   :  { %v1165_v17 = vpop.xlane.xlu0 %1164 }
 0x4c7   :  { %v1171_v35 = vpop.xlane.xlu1 %1170 }
 0x4c8   :  { %v1169_v16 = vpop.xlane.xlu0 %1168 }
 0x4cf   :  { %v1175_v36 = vpop.xlane.xlu1 %1174 }
 0x4d0   :  { %v1173_v39 = vpop.xlane.xlu0 %1172 }
 0x4d3   :  { %v1199_v56 = vpop.permute.xlu1 %1198 }
 0x4d4   :  { %v1203_v19 = vrot.slane %v1199_v56, %v1202_v3  ;;  %v1179_v31 = vpop.xlane.xlu0 %1178  ;;  %v1341_v56 = vsub.s32 %v1338_v6, %v2430_v37 }
 0x4d6   :  { %v1206_v46 = vadd.f32 %v1203_v19, %v1167_v7  ;;  %v1205_v40 = vadd.f32 %v1203_v19, %v1165_v17  ;;  %v1208_v50 = vadd.f32 %v1203_v19, %v1171_v35  ;;  %v1210_v24 = vadd.f32 %v1203_v19, %v1175_v36 }
 0x4d7   :  { %v1212_v38 = vadd.f32 %v1203_v19, %v1179_v31  ;;  %v1207_v55 = vadd.f32 %v1203_v19, %v1169_v16  ;;  %v1209_v59 = vadd.f32 %v1203_v19, %v1173_v39  ;;  %v1320_v7 = vsub.s32 %v1317_v28, %v2430_v37 }
 0x4d8   :  { %1241 = vperm.xlu1 %1686, %v1206_v46   ;;  %1238 = vperm.xlu0 %1687, %v1205_v40   ;;  %v1177_v12 = vpop.xlane.xlu0 %1176  ;;  %v1331_v17 = vadd.s32 4294967240, %v1914_v57  ;;  %v1345_v40 = vadd.s32 4294967224, %v1914_v57 }
 0x4d9   :  { %v1211_v1 = vadd.f32 %v1203_v19, %v1177_v12 }
 0x4da   :  { %v1334_v46 = vsub.s32 %v1331_v17, %v2430_v37 }
 0x4dc   :  { %1247 = vperm.xlu1 %1686, %v1208_v50   ;;  %1253 = vperm.xlu0 %1687, %v1210_v24   ;;  %v1183_v51 = vpop.xlane.xlu0 %1182  ;;  %v1359_v24 = vadd.s32 4294967208, %v1914_v57 }
 0x4dd   :  { %v1214_v0 = vadd.f32 %v1203_v19, %v1183_v51 }
 0x4e0   :  { %1244 = vperm.xlu1 %1686, %v1207_v55   ;;  %1259 = vperm.xlu0 %1687, %v1212_v38   ;;  %v1181_v30 = vpop.xlane.xlu0 %1180 }
 0x4e1   :  { %v1213_v18 = vadd.f32 %v1203_v19, %v1181_v30 }
 0x4e4   :  { %1250 = vperm.xlu1 %1686, %v1209_v59   ;;  %1265 = vperm.xlu0 %1687, %v1214_v0   ;;  %v1185_v52 = vpop.xlane.xlu0 %1184  ;;  %v1348_v0 = vsub.s32 %v1345_v40, %v2430_v37 }
 0x4e5   :  { %v1215_v48 = vadd.f32 %v1203_v19, %v1185_v52  ;;  %v1366_v52 = vadd.s32 4294967200, %v1914_v57 }
 0x4e8   :  { %1256 = vperm.xlu1 %1686, %v1211_v1   ;;  %v1191_v53 = vpop.xlane.xlu0 %1190 }
 0x4e9   :  { %v1218_v25 = vadd.f32 %v1203_v19, %v1191_v53  ;;  %v1362_v53 = vsub.s32 %v1359_v24, %v2430_v37 }
 0x4ec   :  { %1262 = vperm.xlu1 %1686, %v1213_v18   ;;  %v1189_v58 = vpop.xlane.xlu0 %1188  ;;  %v1373_v18 = vadd.s32 4294967192, %v1914_v57 }
 0x4ed   :  { %v1217_v60 = vadd.f32 %v1203_v19, %v1189_v58 }
 0x4f0   :  { %1268 = vperm.xlu1 %1686, %v1215_v48   ;;  %v1193_v41 = vpop.xlane.xlu0 %1192 }
 0x4f1   :  { %v1219_v62 = vadd.f32 %v1203_v19, %v1193_v41 }
 0x4f4   :  { %1274 = vperm.xlu1 %1686, %v1217_v60   ;;  %v1195_v11 = vpop.xlane.xlu0 %1194 }
 0x4f5   :  { %v1220_v42 = vadd.f32 %v1203_v19, %v1195_v11 }
 0x4f8   :  { %1280 = vperm.xlu1 %1686, %v1219_v62   ;;  %v1369_v62 = vsub.s32 %v1366_v52, %v2430_v37 }
 0x504   :  { %v1187_v45 = vpop.xlane.xlu1 %1186 }
 0x505   :  { %v1216_v63 = vadd.f32 %v1203_v19, %v1187_v45  ;;  %v1352_v19 = vadd.s32 4294967216, %v1914_v57  ;;  %v1380_v45 = vadd.s32 4294967184, %v1914_v57 }
 0x507   :  { %1271 = vperm.xlu0 %1687, %v1216_v63   ;;  %v1355_v55 = vsub.s32 %v1352_v19, %v2430_v37  ;;  %v1383_v10 = vsub.s32 %v1380_v45, %v2430_v37 }
 0x50b   :  { %1277 = vperm.xlu0 %1687, %v1218_v25  }
 0x50f   :  { %1283 = vperm.xlu0 %1687, %v1220_v42   ;;  %v1376_v42 = vsub.s32 %v1373_v18, %v2430_v37 }
 0x557   :  { %v1242_v4 = vpop.permute.xlu1 %1241  ;;  %v1239_v20 = vpop.permute.xlu0 %1238 }
 0x558   :  { %v1293_v26 = vrot.slane %v1242_v4, %v1292_v23  ;;  %v1288_v43 = vrot.slane %v1239_v20, %v1287_v47  ;;  %v1387_v4 = vadd.s32 4294967176, %v1914_v57 }
 0x55a   :  { %v1295_v34 = vsel %vm1294_vm4, %v1293_v26, %v1288_v43  ;;  %v1390_v20 = vsub.s32 %v1387_v4, %v2430_v37 }
 0x55b   :  { %v1248_v5 = vpop.permute.xlu1 %1247  ;;  %v1254_v54 = vpop.permute.xlu0 %1253 }
 0x55c   :  { %v1307_v32 = vrot.slane %v1248_v5, %v1306_v14  ;;  %v1321_v31 = vrot.slane %v1254_v54, %v1320_v7 }
 0x55f   :  { %v1245_v8 = vpop.permute.xlu1 %1244  ;;  %v1260_v36 = vpop.permute.xlu0 %1259 }
 0x560   :  { %v1300_v49 = vrot.slane %v1245_v8, %v1299_v21  ;;  %v1335_v30 = vrot.slane %v1260_v36, %v1334_v46 }
 0x562   :  { %v1302_v27 = vsel %vm1301_vm5, %v1300_v49, %v1295_v34 }
 0x563   :  { %v1251_v61 = vpop.permute.xlu1 %1250  ;;  %v1309_v16 = vsel %vm1308_vm6, %v1307_v32, %v1302_v27  ;;  %v1266_v59 = vpop.permute.xlu0 %1265 }
 0x564   :  { %v1314_v33 = vrot.slane %v1251_v61, %v1313_v13  ;;  %v1349_v60 = vrot.slane %v1266_v59, %v1348_v0 }
 0x566   :  { %v1316_v39 = vsel %vm1315_vm7, %v1314_v33, %v1309_v16 }
 0x567   :  { %v1257_v15 = vpop.permute.xlu1 %1256  ;;  %v1323_v12 = vsel %vm1322_vm8, %v1321_v31, %v1316_v39 }
 0x568   :  { %v1328_v3 = vrot.slane %v1257_v15, %v1327_v29 }
 0x56a   :  { %v1330_v51 = vsel %vm1329_vm9, %v1328_v3, %v1323_v12 }
 0x56b   :  { %v1263_v35 = vpop.permute.xlu1 %1262  ;;  %v1337_v1 = vsel %vm1336_vm10, %v1335_v30, %v1330_v51 }
 0x56c   :  { %v1342_v38 = vrot.slane %v1263_v35, %v1341_v56 }
 0x56e   :  { %v1344_v58 = vsel %vm1343_vm11, %v1342_v38, %v1337_v1 }
 0x56f   :  { %v1269_v50 = vpop.permute.xlu1 %1268  ;;  %v1351_v25 = vsel %vm1350_vm12, %v1349_v60, %v1344_v58 }
 0x570   :  { %v1356_v48 = vrot.slane %v1269_v50, %v1355_v55 }
 0x572   :  { %v1358_v5 = vsel %vm1357_vm13, %v1356_v48, %v1351_v25 }
 0x573   :  { %v1275_v41 = vpop.permute.xlu1 %1274 }
 0x574   :  { %v1370_v9 = vrot.slane %v1275_v41, %v1369_v62 }
 0x577   :  { %v1281_v23 = vpop.permute.xlu1 %1280 }
 0x578   :  { %v1384_v22 = vrot.slane %v1281_v23, %v1383_v10 }
 0x586   :  { %v1272_v63 = vpop.permute.xlu0 %1271 }
 0x587   :  { %v1363_v11 = vrot.slane %v1272_v63, %v1362_v53 }
 0x589   :  { %v1365_v8 = vsel %vm1364_vm14, %v1363_v11, %v1358_v5 }
 0x58a   :  { %v1278_v61 = vpop.permute.xlu0 %1277  ;;  %v1372_v21 = vsel %vm1371_vm15, %v1370_v9, %v1365_v8 }
 0x58b   :  { %v1377_v47 = vrot.slane %v1278_v61, %v1376_v42 }
 0x58d   :  { %v1379_v2 = vsel %vm1378_vm0, %v1377_v47, %v1372_v21 }
 0x58e   :  { %v1284_v26 = vpop.permute.xlu0 %1283  ;;  %v1386_v57 = vsel %vm1385_vm1, %v1384_v22, %v1379_v2 }
 0x58f   :  { %v1391_v43 = vrot.slane %v1284_v26, %v1390_v20 }
 0x591   :  { %v1393_v15 = vsel %vm1392_vm2, %v1391_v43, %v1386_v57 }
 0x592   :  { %1395 = vst [vmem:[%s2474_s6] sm:$0x1] %v1393_v15 }

</bundles_post_ra>
